<compile_context>
chip_gen: v6e
topology: v6e:2x2x1
jax: 0.10.0
libtpu: 0.0.40
codegen_flags: <defaults>
</compile_context>

<pallas_src>
import functools

import jax
import jax.numpy as jnp
import numpy as np
from jax import lax
from jax.experimental import pallas as pl
from jax.experimental.pallas import tpu as pltpu


def _round_up(x, m):
    return (x + m - 1) // m * m


# ---------------------------------------------------------------------------
# KNN index construction (glue, plain JAX — replaces scipy KDTree in __init__)
# ---------------------------------------------------------------------------
def knn_indices(in_locs, out_locs, k):
    # in_locs: (N_in, D), out_locs: (N_out, D)
    d2 = jnp.sum((out_locs[:, None, :] - in_locs[None, :, :]) ** 2, axis=-1)
    _, idx = jax.lax.top_k(-d2, k)          # k smallest distances
    return idx.astype(jnp.int32)            # (N_out, k)


# ---------------------------------------------------------------------------
# Kernel A: row gather + running max (general N_in)
# ---------------------------------------------------------------------------
def _maxpool_gather_kernel(idx_ref, x_ref, o_ref, *,
                           k, rows_per_group, groups_per_tile, unroll):
    # idx_ref : SMEM (N_out_pad * k,) int32   (scalar-prefetched, pre-padded)
    # x_ref   : VMEM (N_in, tile_bc)          (constant across the row axis)
    # o_ref   : VMEM (tile_out, tile_bc)
    tile_out = rows_per_group * groups_per_tile
    base_row = pl.program_id(1) * tile_out

    def group(g, carry):
        r0 = pl.multiple_of(g * rows_per_group, rows_per_group)
        base0 = (base_row + r0) * k            # one scalar mul per group
        rows = []
        for rr in range(rows_per_group):       # static unroll: ILP per group
            b = base0 + rr * k                 # static offsets -> scalar adds
            acc = x_ref[pl.ds(idx_ref[b], 1), :]
            for j in range(1, k):              # running max: 2 live values/row
                acc = jnp.maximum(acc, x_ref[pl.ds(idx_ref[b + j], 1), :])
            rows.append(acc)
        # One full sublane-group store instead of rows_per_group masked vst's.
        o_ref[pl.ds(r0, rows_per_group), :] = jnp.concatenate(rows, axis=0)
        return carry

    lax.fori_loop(0, groups_per_tile, group, 0, unroll=unroll)


# ---------------------------------------------------------------------------
# Kernel B: one-hot selection on the MXU (small-N_in fast path)
# ---------------------------------------------------------------------------
def _maxpool_onehot_kernel(idx_ref, x_ref, o_ref, *, k, n_in):
    # idx_ref : VMEM (tile_out, k) int32
    # x_ref   : VMEM (N_in, tile_bc)
    # o_ref   : VMEM (tile_out, tile_bc)
    idx = idx_ref[...]
    x = x_ref[...]
    iota = lax.broadcasted_iota(jnp.int32, (idx.shape[0], n_in), 1)
    # HIGHEST keeps the f32 selection bit-exact on the MXU (each one-hot row
    # picks exactly one x row; everything else multiplies by 0).
    prec = lax.Precision.HIGHEST if x.dtype == jnp.float32 else None
    acc = None
    for j in range(k):
        onehot = (iota == idx[:, j:j + 1]).astype(x.dtype)   # (tile_out, n_in)
        v = jnp.dot(onehot, x, preferred_element_type=jnp.float32,
                    precision=prec)                           # (tile_out, tile_bc)
        acc = v if acc is None else jnp.maximum(acc, v)
    o_ref[...] = acc.astype(o_ref.dtype)


# ---------------------------------------------------------------------------
# Wrapper
# ---------------------------------------------------------------------------
def _vmem_capacity_bytes():
    try:
        return int(pltpu.get_tpu_info().vmem_capacity_bytes)
    except Exception:
        return 64 << 20                         # conservative: v7x per-TC VMEM


def maxpool_pallas(x, idx, *, tile_out=128, tile_bc=1024, method="auto",
                   unroll=2):
    """x: (B, C, N_in), idx: (N_out, k) int32  ->  (B, C, N_out)."""
    B, C, N_in = x.shape
    N_out, k = idx.shape
    BC = B * C
    dtype = x.dtype
    itemsize = jnp.dtype(dtype).itemsize
    sub = max(8, 32 // itemsize)                # dtype min sublane multiple

    if method == "auto":
        # One-hot MXU selection wins while an x column is tiny (<= 512 B);
        # flops scale with N_in so gather wins for large N_in.
        method = "onehot" if N_in * itemsize <= 512 else "gather"

    # ---- lane (B*C) tiling ---------------------------------------------------
    bc_pad0 = max(_round_up(BC, 128), 128)
    tile_bc = max(128, _round_up(min(tile_bc, bc_pad0), 128))
    if bc_pad0 >= 256:
        # Prefer >=2 channel blocks so a 2-TC (v7x) split lands on the lane
        # axis: disjoint per-core x residency, no duplicated HBM reads.
        tile_bc = min(tile_bc, max(128, _round_up(bc_pad0 // 2, 128)))
    if method == "gather":
        # Bound live vregs in a row group (sub rows x tile_bc/128 lane vregs
        # ~= 32 vregs) so the grouped store never spills.
        tile_bc = min(tile_bc, max(128, _round_up(4096 // sub, 128)))

    # ---- row (N_out) tiling ----------------------------------------------------
    tile_out = min(_round_up(max(tile_out, sub), sub), _round_up(N_out, sub))

    # ---- VMEM guard ------------------------------------------------------------
    def vmem_need(t_out, t_bc):
        need = 2 * N_in * t_bc * itemsize        # x block (2x: conservative)
        need += 2 * t_out * t_bc * itemsize      # output block (double-buffered)
        if method == "onehot":
            need += 2 * t_out * 128 * 4                          # idx block
            need += t_out * N_in * 4 + 2 * t_out * t_bc * 4      # intermediates
        return need

    cap = _vmem_capacity_bytes()
    budget = cap - (8 << 20)
    while vmem_need(tile_out, tile_bc) > budget and tile_bc > 128:
        tile_bc = max(128, _round_up(tile_bc // 2, 128))
    while vmem_need(tile_out, tile_bc) > budget and tile_out > sub:
        tile_out = max(sub, _round_up(tile_out // 2, sub))
    # TODO(synk): if 2*N_in*128*itemsize still exceeds VMEM (huge N_in), fall
    # back to HBM-resident x (memory_space=pl.ANY) with manual gather DMA.
    vmem_limit = int(min(max(vmem_need(tile_out, tile_bc) + (4 << 20), 32 << 20),
                         cap))

    n_bc_blocks = pl.cdiv(BC, tile_bc)
    BC_pad = n_bc_blocks * tile_bc
    n_row_blocks = pl.cdiv(N_out, tile_out)
    N_out_pad = n_row_blocks * tile_out

    # ---- lane-dense layout ------------------------------------------------------
    # (B, C, N_in) -> (N_in, B*C), lane axis padded to BC_pad.
    # TODO(synk): keep activations in (N, B*C) layout across the model so these
    # two wrapper-side HBM transposes disappear.
    xt = jnp.transpose(x, (2, 0, 1)).reshape(N_in, BC)
    if BC_pad != BC:
        xt = jnp.pad(xt, ((0, 0), (0, BC_pad - BC)))

    # idx: clamp (VMEM OOB reads are unchecked at runtime) and edge-pad the rows
    # to N_out_pad so the kernel needs no per-row tail clamp.
    idx2d = jnp.clip(idx.astype(jnp.int32), 0, N_in - 1)
    if N_out_pad != N_out:
        idx2d = jnp.pad(idx2d, ((0, N_out_pad - N_out), (0, 0)), mode="edge")

    out_shape = jax.ShapeDtypeStruct((N_out_pad, BC_pad), dtype)
    cparams = pltpu.CompilerParams(
        dimension_semantics=("parallel", "parallel"),
        vmem_limit_bytes=vmem_limit)

    def build(single_buffer_x):
        x_kwargs = {}
        if single_buffer_x:
            # x's block index is constant along the row axis -> one buffer is
            # enough and halves the dominant VMEM term.
            x_kwargs["pipeline_mode"] = pl.Buffered(1)
        x_spec = pl.BlockSpec((N_in, tile_bc), lambda c, i, *_: (0, c),
                              **x_kwargs)
        o_spec = pl.BlockSpec((tile_out, tile_bc), lambda c, i, *_: (i, c))

        if method == "onehot":
            kern = functools.partial(_maxpool_onehot_kernel, k=k, n_in=N_in)
            grid_spec = pltpu.PrefetchScalarGridSpec(
                num_scalar_prefetch=0,
                grid=(n_bc_blocks, n_row_blocks),
                in_specs=[pl.BlockSpec((tile_out, k), lambda c, i: (i, 0)),
                          x_spec],
                out_specs=o_spec)
            args = (idx2d, xt)
        else:
            rows_per_group = sub
            groups_per_tile = tile_out // rows_per_group
            kern = functools.partial(
                _maxpool_gather_kernel, k=k, rows_per_group=rows_per_group,
                groups_per_tile=groups_per_tile,
                unroll=max(1, min(unroll, groups_per_tile)))
            # idx lives in SMEM via scalar prefetch (1-D -> next-pow2 padding).
            # TODO(synk): for very large N_out*k (>~512 KiB) feed idx per row
            # block through an SMEM BlockSpec instead of scalar prefetch.
            grid_spec = pltpu.PrefetchScalarGridSpec(
                num_scalar_prefetch=1,
                grid=(n_bc_blocks, n_row_blocks),
                in_specs=[x_spec],
                out_specs=o_spec)
            args = (idx2d.reshape(-1), xt)

        return pl.pallas_call(
            kern, out_shape=out_shape, grid_spec=grid_spec,
            compiler_params=cparams)(*args)

    try:
        out = build(True)
    except Exception:
        # Per-block pipeline_mode unsupported on this JAX build -> default
        # double-buffering (correctness unchanged, slightly more VMEM).
        out = build(False)

    # (N_out_pad, BC_pad) -> (B, C, N_out)
    out = out[:N_out, :BC].reshape(N_out, B, C)
    return jnp.transpose(out, (1, 2, 0))


# ---------------------------------------------------------------------------
# Demo / self-check
# ---------------------------------------------------------------------------
if __name__ == "__main__":
    key = jax.random.PRNGKey(0)

    # --- test 1: regular grids (8x8 -> 4x4); small N_in -> one-hot MXU path --
    B, C, K = 2, 4, 4
    gi = jnp.linspace(0.0, 1.0, 8)
    in_locs = jnp.stack(jnp.meshgrid(gi, gi, indexing="ij"), -1).reshape(-1, 2)
    go = jnp.linspace(0.0, 1.0, 4)
    out_locs = jnp.stack(jnp.meshgrid(go, go, indexing="ij"), -1).reshape(-1, 2)
    idx = knn_indices(in_locs, out_locs, K)                # (16, 4)

    kx, key = jax.random.split(key)
    x = jax.random.normal(kx, (B, C, in_locs.shape[0]), dtype=jnp.float32)

    y = jax.block_until_ready(maxpool_pallas(x, idx))
    y_ref = jnp.max(x[:, :, idx], axis=-1)                 # torch: x[:,:,idx].max(-1)
    np.testing.assert_allclose(np.asarray(y), np.asarray(y_ref),
                               rtol=1e-6, atol=1e-6)

    # --- test 2: irregular cloud; lane padding + tail rows (one-hot path) ----
    B2, C2, N_in2, N_out2, K2 = 1, 3, 50, 12, 3
    k1, k2, k3, key = jax.random.split(key, 4)
    in_locs2 = jax.random.uniform(k1, (N_in2, 3))
    out_locs2 = jax.random.uniform(k2, (N_out2, 3))
    idx2 = knn_indices(in_locs2, out_locs2, K2)
    x2 = jax.random.normal(k3, (B2, C2, N_in2), dtype=jnp.float32)

    y2 = jax.block_until_ready(maxpool_pallas(x2, idx2))
    y2_ref = jnp.max(x2[:, :, idx2], axis=-1)
    np.testing.assert_allclose(np.asarray(y2), np.asarray(y2_ref),
                               rtol=1e-6, atol=1e-6)

    # --- test 3: same data, gather path forced (SMEM idx + grouped stores) ---
    y3 = jax.block_until_ready(maxpool_pallas(x2, idx2, method="gather"))
    np.testing.assert_allclose(np.asarray(y3), np.asarray(y2_ref),
                               rtol=1e-6, atol=1e-6)

    # --- test 4: bf16, larger N_in -> auto picks gather; dtype-aware 16-row
    #     sublane groups and tail handling ------------------------------------
    B4, C4, N_in4, N_out4, K4 = 2, 3, 384, 40, 5
    k1, k2, k3, key = jax.random.split(key, 4)
    in_locs4 = jax.random.uniform(k1, (N_in4, 2))
    out_locs4 = jax.random.uniform(k2, (N_out4, 2))
    idx4 = knn_indices(in_locs4, out_locs4, K4)
    x4 = jax.random.normal(k3, (B4, C4, N_in4), dtype=jnp.bfloat16)

    y4 = jax.block_until_ready(maxpool_pallas(x4, idx4))
    y4_ref = jnp.max(x4[:, :, idx4], axis=-1)
    np.testing.assert_array_equal(np.asarray(y4.astype(jnp.float32)),
                                  np.asarray(y4_ref.astype(jnp.float32)))

    print("KERNEL_OK")
</pallas_src>

<mosaic_0001>
module attributes {stable_mosaic.version = 11 : i64} {
  func.func @_maxpool_onehot_kernel(%arg0: i32, %arg1: i32, %arg2: memref<16x4xi32, #tpu.memory_space<vmem>>, %arg3: memref<64x128xf32, #tpu.memory_space<vmem>>, %arg4: memref<16x128xf32, #tpu.memory_space<vmem>>) attributes {dimension_semantics = [#tpu.dimension_semantics<parallel>, #tpu.dimension_semantics<parallel>], iteration_bounds = array<i64: 1, 1>, scalar_prefetch = 0 : i64, scratch_operands = 0 : i64, tpu.core_type = #tpu.core_type<tc>, window_params = [{transform_indices = @transform_0, window_bounds = array<i64: 16, 4>}, {pipeline_mode = #tpu.pipeline_mode<synchronous>, transform_indices = @transform_1, window_bounds = array<i64: 64, 128>}, {transform_indices = @transform_2, window_bounds = array<i64: 16, 128>}]} {
    %c0 = arith.constant 0 : index
    %c0_0 = arith.constant 0 : index
    %0 = vector.load %arg2[%c0, %c0_0] : memref<16x4xi32, #tpu.memory_space<vmem>>, vector<16x4xi32>
    %c0_1 = arith.constant 0 : index
    %c0_2 = arith.constant 0 : index
    %1 = vector.load %arg3[%c0_1, %c0_2] : memref<64x128xf32, #tpu.memory_space<vmem>>, vector<64x128xf32>
    %2 = tpu.iota {dimensions = array<i32: 1>} : vector<16x64xi32>
    %3 = vector.extract_strided_slice %0 {offsets = [0, 0], sizes = [16, 1], strides = [1, 1]} : vector<16x4xi32> to vector<16x1xi32>
    %4 = vector.broadcast %3 : vector<16x1xi32> to vector<16x64xi32>
    %5 = arith.cmpi eq, %2, %4 : vector<16x64xi32>
    %6 = arith.extui %5 : vector<16x64xi1> to vector<16x64xi32>
    %7 = arith.sitofp %6 : vector<16x64xi32> to vector<16x64xf32>
    %cst = arith.constant dense<0.000000e+00> : vector<16x128xf32>
    %8 = tpu.matmul %7, %1, %cst {dimension_numbers = #tpu.dot_dimension_numbers<[1], [0], [0], [1], [0, 0, 1, 1], [], []>, precision = #tpu.contract_precision<fp32>} : vector<16x64xf32>, vector<64x128xf32>, vector<16x128xf32> -> vector<16x128xf32>
    %9 = vector.extract_strided_slice %0 {offsets = [0, 1], sizes = [16, 1], strides = [1, 1]} : vector<16x4xi32> to vector<16x1xi32>
    %10 = vector.broadcast %9 : vector<16x1xi32> to vector<16x64xi32>
    %11 = arith.cmpi eq, %2, %10 : vector<16x64xi32>
    %12 = arith.extui %11 : vector<16x64xi1> to vector<16x64xi32>
    %13 = arith.sitofp %12 : vector<16x64xi32> to vector<16x64xf32>
    %cst_3 = arith.constant dense<0.000000e+00> : vector<16x128xf32>
    %14 = tpu.matmul %13, %1, %cst_3 {dimension_numbers = #tpu.dot_dimension_numbers<[1], [0], [0], [1], [0, 0, 1, 1], [], []>, precision = #tpu.contract_precision<fp32>} : vector<16x64xf32>, vector<64x128xf32>, vector<16x128xf32> -> vector<16x128xf32>
    %15 = arith.maximumf %8, %14 : vector<16x128xf32>
    %16 = vector.extract_strided_slice %0 {offsets = [0, 2], sizes = [16, 1], strides = [1, 1]} : vector<16x4xi32> to vector<16x1xi32>
    %17 = vector.broadcast %16 : vector<16x1xi32> to vector<16x64xi32>
    %18 = arith.cmpi eq, %2, %17 : vector<16x64xi32>
    %19 = arith.extui %18 : vector<16x64xi1> to vector<16x64xi32>
    %20 = arith.sitofp %19 : vector<16x64xi32> to vector<16x64xf32>
    %cst_4 = arith.constant dense<0.000000e+00> : vector<16x128xf32>
    %21 = tpu.matmul %20, %1, %cst_4 {dimension_numbers = #tpu.dot_dimension_numbers<[1], [0], [0], [1], [0, 0, 1, 1], [], []>, precision = #tpu.contract_precision<fp32>} : vector<16x64xf32>, vector<64x128xf32>, vector<16x128xf32> -> vector<16x128xf32>
    %22 = arith.maximumf %15, %21 : vector<16x128xf32>
    %23 = vector.extract_strided_slice %0 {offsets = [0, 3], sizes = [16, 1], strides = [1, 1]} : vector<16x4xi32> to vector<16x1xi32>
    %24 = vector.broadcast %23 : vector<16x1xi32> to vector<16x64xi32>
    %25 = arith.cmpi eq, %2, %24 : vector<16x64xi32>
    %26 = arith.extui %25 : vector<16x64xi1> to vector<16x64xi32>
    %27 = arith.sitofp %26 : vector<16x64xi32> to vector<16x64xf32>
    %cst_5 = arith.constant dense<0.000000e+00> : vector<16x128xf32>
    %28 = tpu.matmul %27, %1, %cst_5 {dimension_numbers = #tpu.dot_dimension_numbers<[1], [0], [0], [1], [0, 0, 1, 1], [], []>, precision = #tpu.contract_precision<fp32>} : vector<16x64xf32>, vector<64x128xf32>, vector<16x128xf32> -> vector<16x128xf32>
    %29 = arith.maximumf %22, %28 : vector<16x128xf32>
    %c0_6 = arith.constant 0 : index
    %c0_7 = arith.constant 0 : index
    %30 = vector.load %arg4[%c0_6, %c0_7] : memref<16x128xf32, #tpu.memory_space<vmem>>, vector<16x128xf32>
    tpu.vector_store %arg4[%c0_6, %c0_7], %29 {strides = array<i32>} : memref<16x128xf32, #tpu.memory_space<vmem>>, vector<16x128xf32>,
    return
  }
  func.func @transform_0(%arg0: i32, %arg1: i32) -> (i32, i32) {
    %c0_i32 = arith.constant 0 : i32
    %c0_i32_0 = arith.constant 0 : i32
    return %arg1, %c0_i32 : i32, i32
  }
  func.func @transform_1(%arg0: i32, %arg1: i32) -> (i32, i32) {
    %c0_i32 = arith.constant 0 : i32
    %c0_i32_0 = arith.constant 0 : i32
    return %c0_i32, %arg0 : i32, i32
  }
  func.func @transform_2(%arg0: i32, %arg1: i32) -> (i32, i32) {
    %c0_i32 = arith.constant 0 : i32
    return %arg1, %arg0 : i32, i32
  }
}

module attributes {stable_mosaic.version = 11 : i64} {
  func.func @_maxpool_onehot_kernel(%arg0: i32, %arg1: i32, %arg2: memref<16x4xi32, #tpu.memory_space<vmem>>, %arg3: memref<64x128xf32, #tpu.memory_space<vmem>>, %arg4: memref<16x128xf32, #tpu.memory_space<vmem>>) attributes {dimension_semantics = [#tpu.dimension_semantics<parallel>, #tpu.dimension_semantics<parallel>], iteration_bounds = array<i64: 1, 1>, scalar_prefetch = 0 : i64, scratch_operands = 0 : i64, tpu.core_type = #tpu.core_type<tc>, window_params = [{transform_indices = @transform_0, window_bounds = array<i64: 16, 4>}, {transform_indices = @transform_1, window_bounds = array<i64: 64, 128>}, {transform_indices = @transform_2, window_bounds = array<i64: 16, 128>}]} {
    %c0 = arith.constant 0 : index
    %c0_0 = arith.constant 0 : index
    %0 = vector.load %arg2[%c0, %c0_0] : memref<16x4xi32, #tpu.memory_space<vmem>>, vector<16x4xi32>
    %c0_1 = arith.constant 0 : index
    %c0_2 = arith.constant 0 : index
    %1 = vector.load %arg3[%c0_1, %c0_2] : memref<64x128xf32, #tpu.memory_space<vmem>>, vector<64x128xf32>
    %2 = tpu.iota {dimensions = array<i32: 1>} : vector<16x64xi32>
    %3 = vector.extract_strided_slice %0 {offsets = [0, 0], sizes = [16, 1], strides = [1, 1]} : vector<16x4xi32> to vector<16x1xi32>
    %4 = vector.broadcast %3 : vector<16x1xi32> to vector<16x64xi32>
    %5 = arith.cmpi eq, %2, %4 : vector<16x64xi32>
    %6 = arith.extui %5 : vector<16x64xi1> to vector<16x64xi32>
    %7 = arith.sitofp %6 : vector<16x64xi32> to vector<16x64xf32>
    %cst = arith.constant dense<0.000000e+00> : vector<16x128xf32>
    %8 = tpu.matmul %7, %1, %cst {dimension_numbers = #tpu.dot_dimension_numbers<[1], [0], [0], [1], [0, 0, 1, 1], [], []>, precision = #tpu.contract_precision<fp32>} : vector<16x64xf32>, vector<64x128xf32>, vector<16x128xf32> -> vector<16x128xf32>
    %9 = vector.extract_strided_slice %0 {offsets = [0, 1], sizes = [16, 1], strides = [1, 1]} : vector<16x4xi32> to vector<16x1xi32>
    %10 = vector.broadcast %9 : vector<16x1xi32> to vector<16x64xi32>
    %11 = arith.cmpi eq, %2, %10 : vector<16x64xi32>
    %12 = arith.extui %11 : vector<16x64xi1> to vector<16x64xi32>
    %13 = arith.sitofp %12 : vector<16x64xi32> to vector<16x64xf32>
    %cst_3 = arith.constant dense<0.000000e+00> : vector<16x128xf32>
    %14 = tpu.matmul %13, %1, %cst_3 {dimension_numbers = #tpu.dot_dimension_numbers<[1], [0], [0], [1], [0, 0, 1, 1], [], []>, precision = #tpu.contract_precision<fp32>} : vector<16x64xf32>, vector<64x128xf32>, vector<16x128xf32> -> vector<16x128xf32>
    %15 = arith.maximumf %8, %14 : vector<16x128xf32>
    %16 = vector.extract_strided_slice %0 {offsets = [0, 2], sizes = [16, 1], strides = [1, 1]} : vector<16x4xi32> to vector<16x1xi32>
    %17 = vector.broadcast %16 : vector<16x1xi32> to vector<16x64xi32>
    %18 = arith.cmpi eq, %2, %17 : vector<16x64xi32>
    %19 = arith.extui %18 : vector<16x64xi1> to vector<16x64xi32>
    %20 = arith.sitofp %19 : vector<16x64xi32> to vector<16x64xf32>
    %cst_4 = arith.constant dense<0.000000e+00> : vector<16x128xf32>
    %21 = tpu.matmul %20, %1, %cst_4 {dimension_numbers = #tpu.dot_dimension_numbers<[1], [0], [0], [1], [0, 0, 1, 1], [], []>, precision = #tpu.contract_precision<fp32>} : vector<16x64xf32>, vector<64x128xf32>, vector<16x128xf32> -> vector<16x128xf32>
    %22 = arith.maximumf %15, %21 : vector<16x128xf32>
    %23 = vector.extract_strided_slice %0 {offsets = [0, 3], sizes = [16, 1], strides = [1, 1]} : vector<16x4xi32> to vector<16x1xi32>
    %24 = vector.broadcast %23 : vector<16x1xi32> to vector<16x64xi32>
    %25 = arith.cmpi eq, %2, %24 : vector<16x64xi32>
    %26 = arith.extui %25 : vector<16x64xi1> to vector<16x64xi32>
    %27 = arith.sitofp %26 : vector<16x64xi32> to vector<16x64xf32>
    %cst_5 = arith.constant dense<0.000000e+00> : vector<16x128xf32>
    %28 = tpu.matmul %27, %1, %cst_5 {dimension_numbers = #tpu.dot_dimension_numbers<[1], [0], [0], [1], [0, 0, 1, 1], [], []>, precision = #tpu.contract_precision<fp32>} : vector<16x64xf32>, vector<64x128xf32>, vector<16x128xf32> -> vector<16x128xf32>
    %29 = arith.maximumf %22, %28 : vector<16x128xf32>
    %c0_6 = arith.constant 0 : index
    %c0_7 = arith.constant 0 : index
    %30 = vector.load %arg4[%c0_6, %c0_7] : memref<16x128xf32, #tpu.memory_space<vmem>>, vector<16x128xf32>
    tpu.vector_store %arg4[%c0_6, %c0_7], %29 {strides = array<i32>} : memref<16x128xf32, #tpu.memory_space<vmem>>, vector<16x128xf32>,
    return
  }
  func.func @transform_0(%arg0: i32, %arg1: i32) -> (i32, i32) {
    %c0_i32 = arith.constant 0 : i32
    %c0_i32_0 = arith.constant 0 : i32
    return %arg1, %c0_i32 : i32, i32
  }
  func.func @transform_1(%arg0: i32, %arg1: i32) -> (i32, i32) {
    %c0_i32 = arith.constant 0 : i32
    %c0_i32_0 = arith.constant 0 : i32
    return %c0_i32, %arg0 : i32, i32
  }
  func.func @transform_2(%arg0: i32, %arg1: i32) -> (i32, i32) {
    %c0_i32 = arith.constant 0 : i32
    return %arg1, %arg0 : i32, i32
  }
}

</mosaic_0001>

<bundles_post_ra>
// kernel: tpu_custom_call.1
= control target key start
LH: loop header
LB: loop body
LE: loop exit
PB: predicated region body
PF: predicated region fallthrough
CT: control target
= control target key end

     0   :  { %7 = vsyncpa [#allocation3], 0  ;;  %s3902_s0 = inlined_call_operand.vmem [shape: s32[16,4], index: 0, kind: input, shape index: {}]   ;;  %s3903_s1 = inlined_call_operand.hbm [shape: f32[64,128], index: 1, kind: input, shape index: {}]   ;;  %s3904_s2 = inlined_call_operand.hbm [shape: f32[16,128], index: 2, kind: output, shape index: {}]  }
   0x1   :  { %8 = vsyncpa [#allocation4], 0  ;;  %s3243_s9 = smov [#allocation2]  }
   0x2   :  { %s16_s10 = sshll.u32 %s3243_s9, 4  ;;  %s17_s10 = int_to_ptr.vmem [resolvable:$true] %s16_s10 }
   0x3   :  { %s3207_s11 = scalar_lea.vmem %s17_s10, 1024  ;;  %p3212_p1 = scmp.lt.s32.totalorder %s17_s10, %s17_s10 }
   0x4   :  { %p3208_p0 = scmp.ne.s32.totalorder %s17_s10, %s3207_s11  ;;  %p3213_p2 = scmp.lt.s32.totalorder %s3207_s11, %s3207_s11 }
   0x6   :  { %p3214_p3 = por %p3213_p2, %p3212_p1 }
   0x8   :  { %p3215_p4 = pnand %p3214_p3, %p3208_p0 }
   0xa   :  { %3218 = shalt.err (!%p3215_p4)
}
   0xb   :  { %s3244_s12 = smov 128   ;;  %s3245_s13 = smov 8  }
   0xc   :  { %22 = dma.hbm_to_vmem [thread:$0]  %s3903_s1, 1024, %s17_s10, [#allocation3], %s3244_s12, %s3244_s12, %s3245_s13  }
   0xd   :  { %3239 = dma.done.wait [#allocation3], 1024  }
   0xe   :  { %3240 = vsyncadd [#allocation3], 4294966272  ;;  %v3246_v0 = vmov 0   ;;  %v3247_v1 = vmov 1   ;;  %v3276_v2 = vld [vmem:[%s3902_s0] sm:$0xff]  ;;  %v3281_v3 = vld [vmem:[%s3902_s0 + $0x8] sm:$0xff]  ;;  %v36_v54 = vlaneseq }
   0xf   :  { %3193 = vset.pattern.permute.xlu0 %v3246_v0  ;;  %3194 = vset.pattern.permute.xlu1 %v3247_v1  ;;  %v35_v4 = vld [vmem:[#allocation2 + $0x38] sm:$0xff]  ;;  %v34_v6 = vld [vmem:[#allocation2 + $0x30] sm:$0xff]  ;;  %v33_v7 = vld [vmem:[#allocation2 + $0x28] sm:$0xff]  ;;  %v3248_v35 = vmov 2   ;;  %v3249_v53 = vmov 3   ;;  %vm50_vm0 = vcmask 523264  }
  0x10   :  { %39 = vperm.xlu0 %3193, %v3276_v2   ;;  %638 = vperm.xlu1 %3194, %v3276_v2   ;;  %v3285_v5 = vand.u32 4294901760, %v35_v4  ;;  %v32_v8 = vld [vmem:[#allocation2 + $0x20] sm:$0xff]  ;;  %v3287_v9 = vand.u32 4294901760, %v34_v6  ;;  %v3289_v10 = vand.u32 4294901760, %v33_v7  ;;  %v31_v12 = vld [vmem:[#allocation2 + $0x18] sm:$0xff]  ;;  %v30_v13 = vld [vmem:[#allocation2 + $0x10] sm:$0xff] }
  0x11   :  { %v3291_v11 = vand.u32 4294901760, %v32_v8  ;;  %v29_v14 = vld [vmem:[#allocation2 + $0x8] sm:$0xff]  ;;  %v3296_v16 = vand.u32 4294901760, %v31_v12  ;;  %v3299_v17 = vand.u32 4294901760, %v30_v13  ;;  %v28_v19 = vld [vmem:[#allocation2] sm:$0xff]  ;;  %v3421_v55 = vand.u32 127, %v36_v54 }
  0x12   :  { %v3294_v15 = vsub.f32 %v35_v4, %v3285_v5  ;;  %2728 = vmatprep.subr.mxu0 %v3285_v5  ;;  %v3301_v18 = vand.u32 4294901760, %v29_v14  ;;  %v3304_v20 = vsub.f32 %v34_v6, %v3287_v9  ;;  %v3307_v21 = vsub.f32 %v33_v7, %v3289_v10  ;;  %s3251_s0 = smov [#allocation5]  }
  0x13   :  { %v3310_v22 = vsub.f32 %v32_v8, %v3291_v11  ;;  %2729 = vmatpush3.msra.mxu0 %v3285_v5  ;;  %v3319_v24 = vsub.f32 %v31_v12, %v3296_v16  ;;  %v3322_v25 = vsub.f32 %v30_v13, %v3299_v17  ;;  %v3324_v26 = vand.u32 4294901760, %v28_v19  ;;  %s2444_s1 = sshll.u32 %s3251_s0, 4  ;;  %s2445_s1 = int_to_ptr.vmem [resolvable:$true] %s2444_s1 }
  0x14   :  { %42 = vperm.xlu0 %3193, %v3281_v3   ;;  %641 = vperm.xlu1 %3194, %v3281_v3   ;;  %v3316_v23 = vand.u32 4294901760, %v3294_v15  ;;  %v3327_v27 = vand.u32 4294901760, %v3304_v20  ;;  %v3330_v28 = vand.u32 4294901760, %v3307_v21  ;;  %v3343_v32 = vsub.f32 %v29_v14, %v3301_v18  ;;  %s3219_s20 = scalar_lea.vmem %s2445_s1, 256  ;;  %p3224_p6 = scmp.lt.s32.totalorder %s2445_s1, %s2445_s1 }
  0x15   :  { %v3333_v29 = vand.u32 4294901760, %v3310_v22  ;;  %2730 = vmatprep.subr.mxu0 %v3287_v9  ;;  %v3339_v31 = vand.u32 4294901760, %v3319_v24  ;;  %v3355_v38 = vand.u32 4294901760, %v3322_v25  ;;  %v3358_v39 = vsub.f32 %v28_v19, %v3324_v26  ;;  %p3220_p5 = scmp.ne.s32.totalorder %s2445_s1, %s3219_s20  ;;  %p3225_p7 = scmp.lt.s32.totalorder %s3219_s20, %s3219_s20 }
  0x16   :  { %v170_v30 = vsub.f32 %v3294_v15, %v3316_v23  ;;  %2731 = vmatpush3.msra.mxu0 %v3287_v9  ;;  %v177_v33 = vsub.f32 %v3304_v20, %v3327_v27  ;;  %v184_v34 = vsub.f32 %v3307_v21, %v3330_v28  ;;  %v3370_v43 = vand.u32 4294901760, %v3343_v32 }
  0x17   :  { %2732 = vmatprep.subr.mxu0 %v3289_v10  ;;  %v191_v37 = vsub.f32 %v3310_v22, %v3333_v29  ;;  %v198_v42 = vsub.f32 %v3319_v24, %v3339_v31  ;;  %v205_v45 = vsub.f32 %v3322_v25, %v3355_v38  ;;  %v3381_v46 = vand.u32 4294901760, %v3358_v39  ;;  %p3226_p8 = por %p3225_p7, %p3224_p6 }
  0x18   :  { %3195 = vset.pattern.permute.xlu0 %v3248_v35  ;;  %3196 = vset.pattern.permute.xlu1 %v3248_v35  ;;  %v3350_v36 = vand.u32 4294901760, %v170_v30  ;;  %v3362_v40 = vand.u32 4294901760, %v177_v33  ;;  %v3365_v41 = vand.u32 4294901760, %v184_v34  ;;  %v212_v48 = vsub.f32 %v3343_v32, %v3370_v43 }
  0x19   :  { %1238 = vperm.xlu0 %3195, %v3276_v2   ;;  %1241 = vperm.xlu1 %3196, %v3281_v3   ;;  %v3376_v44 = vand.u32 4294901760, %v191_v37  ;;  %v3387_v47 = vand.u32 4294901760, %v198_v42  ;;  %v3395_v49 = vand.u32 4294901760, %v205_v45  ;;  %v219_v50 = vsub.f32 %v3358_v39, %v3381_v46  ;;  %p3227_p9 = pnand %p3226_p8, %p3220_p5 }
  0x1a   :  { %2747 = vmatprep.subr.mxu1 %v3350_v36  ;;  %2733 = vmatpush3.msra.mxu0 %v3289_v10  ;;  %v3403_v51 = vand.u32 4294901760, %v212_v48  ;;  %v3250_v58 = vmov 0.0  }
  0x1b   :  { %2748 = vmatpush3.msra.mxu1 %v3350_v36  ;;  %2734 = vmatprep.subr.mxu0 %v3291_v11  ;;  %v3409_v52 = vand.u32 4294901760, %v219_v50 }
  0x1c   :  { %2749 = vmatprep.subr.mxu1 %v3362_v40  ;;  %2735 = vmatpush3.msra.mxu0 %v3291_v11 }
  0x1d   :  { %2750 = vmatpush3.msra.mxu1 %v3362_v40  ;;  %2736 = vmatprep.subr.mxu0 %v3296_v16 }
  0x1e   :  { %2751 = vmatprep.subr.mxu1 %v3365_v41  ;;  %2737 = vmatpush3.msra.mxu0 %v3296_v16 }
  0x1f   :  { %2752 = vmatpush3.msra.mxu1 %v3365_v41  ;;  %2738 = vmatprep.subr.mxu0 %v3299_v17 }
  0x20   :  { %2753 = vmatprep.subr.mxu1 %v3376_v44  ;;  %2739 = vmatpush3.msra.mxu0 %v3299_v17 }
  0x21   :  { %2754 = vmatpush3.msra.mxu1 %v3376_v44  ;;  %2740 = vmatprep.subr.mxu0 %v3301_v18 }
  0x22   :  { %2755 = vmatprep.subr.mxu1 %v3387_v47  ;;  %2741 = vmatpush3.msra.mxu0 %v3301_v18 }
  0x23   :  { %2756 = vmatpush3.msra.mxu1 %v3387_v47  ;;  %2742 = vmatprep.subr.mxu0 %v3324_v26 }
  0x24   :  { %2757 = vmatprep.subr.mxu1 %v3395_v49  ;;  %2743 = vmatpush3.msra.mxu0 %v3324_v26 }
  0x25   :  { %2758 = vmatpush3.msra.mxu1 %v3395_v49  ;;  %2766 = vmatprep.subr.mxu0 %v3294_v15 }
  0x26   :  { %2759 = vmatprep.subr.mxu1 %v3403_v51  ;;  %3197 = vset.pattern.permute.xlu1 %v3249_v53 }
  0x27   :  { %2760 = vmatpush3.msra.mxu1 %v3403_v51  ;;  %1838 = vperm.xlu1 %3197, %v3276_v2  }
  0x28   :  { %2761 = vmatprep.subr.mxu1 %v3409_v52  ;;  %3198 = vset.pattern.permute.xlu0 %v3249_v53 }
  0x29   :  { %2762 = vmatpush3.msra.mxu1 %v3409_v52  ;;  %1841 = vperm.xlu0 %3198, %v3281_v3  }
  0x2a   :  { %2785 = vmatprep.subr.mxu1 %v3285_v5 }
  0x8b   :  { %v40_v56 = vpop.permute.xlu0 %39  ;;  %v3423_v57 = vpop.permute.xlu1 %638 }
  0x8c   :  { %vm44_vm1 = vcmp.eq.s32.totalorder %v3421_v55, %v40_v56  ;;  %vm643_vm7 = vcmp.eq.s32.totalorder %v3421_v55, %v3423_v57 }
  0x8d   :  { %v3427_v59 = vsel %vm44_vm1, 1.0, %v3250_v58  ;;  %v3523_v42 = vsel %vm643_vm7, 1.0, %v3250_v58 }
  0x8e   :  { %v52_v60 = vsel %vm50_vm0, %v3427_v59, 0  ;;  %2763 = vmatprep.mubr.msk.f32.mxu1 %vm50_vm0, %v3427_v59  ;;  %v650_v45 = vsel %vm50_vm0, %v3523_v42, 0 }
  0x8f   :  { %v131_v61 = vsub.f32 %v52_v60, %v52_v60  ;;  %v43_v62 = vpop.permute.xlu0 %42  ;;  %v3434_v63 = vpop.permute.xlu1 %641  ;;  %v729_v48 = vsub.f32 %v650_v45, %v650_v45 }
  0x90   :  { %vm45_vm2 = vcmp.eq.s32.totalorder %v3421_v55, %v43_v62  ;;  %vm644_vm8 = vcmp.eq.s32.totalorder %v3421_v55, %v3434_v63 }
  0x91   :  { %v3437_v0 = vsel %vm45_vm2, 1.0, %v3250_v58  ;;  %v132_v1 = vand.u32 4294901760, %v131_v61  ;;  %v3544_v50 = vsel %vm644_vm8, 1.0, %v3250_v58  ;;  %v730_v54 = vand.u32 4294901760, %v729_v48 }
  0x92   :  { %v55_v2 = vsel %vm50_vm0, %v3437_v0, 0  ;;  %2764 = vmatmul.mubr.msk.f32.vlgmr.msra.gmra.mxu1 %vm50_vm0, %v3437_v0  ;;  %v653_v53 = vsel %vm50_vm0, %v3544_v50, 0 }
  0x93   :  { %v141_v3 = vsub.f32 %v55_v2, %v55_v2  ;;  %2786 = vmatpush3.msra.mxu1 %v3285_v5  ;;  %2801 = vmatprep.mubr.f32.mxu1 %v132_v1  ;;  %v133_v4 = vsub.f32 %v131_v61, %v132_v1  ;;  %v731_v56 = vsub.f32 %v729_v48, %v730_v54 }
  0x94   :  { %2787 = vmatprep.subr.mxu1 %v3287_v9  ;;  %v1239_v6 = vpop.permute.xlu0 %1238  ;;  %v1242_v7 = vpop.permute.xlu1 %1241 }
  0x95   :  { %2788 = vmatpush3.msra.mxu1 %v3287_v9  ;;  %v134_v8 = vand.u32 4294901760, %v133_v4  ;;  %v142_v12 = vand.u32 4294901760, %v141_v3  ;;  %vm1243_vm3 = vcmp.eq.s32.totalorder %v3421_v55, %v1239_v6  ;;  %vm1244_vm4 = vcmp.eq.s32.totalorder %v3421_v55, %v1242_v7 }
  0x96   :  { %2789 = vmatprep.subr.mxu1 %v3289_v10  ;;  %v3449_v13 = vsel %vm1243_vm3, 1.0, %v3250_v58  ;;  %v3454_v19 = vsel %vm1244_vm4, 1.0, %v3250_v58 }
  0x97   :  { %2790 = vmatpush3.msra.mxu1 %v3289_v10  ;;  %2744 = vmatprep.mubr.f32.mxu0 %v134_v8  ;;  %v143_v14 = vsub.f32 %v141_v3, %v142_v12  ;;  %v1253_v62 = vsel %vm50_vm0, %v3454_v19, 0 }
  0x98   :  { %2791 = vmatprep.subr.mxu1 %v3291_v11 }
  0x99   :  { %2792 = vmatpush3.msra.mxu1 %v3291_v11  ;;  %v144_v30 = vand.u32 4294901760, %v143_v14 }
  0x9a   :  { %2793 = vmatprep.subr.mxu1 %v3296_v16 }
  0x9b   :  { %2794 = vmatpush3.msra.mxu1 %v3296_v16  ;;  %2745 = vmatmul.mubr.f32.vlgmr.msra.gmra.mxu0 %v144_v30 }
  0x9c   :  { %2767 = vmatpush3.msra.mxu0 %v3294_v15  ;;  %2795 = vmatprep.subr.mxu1 %v3299_v17 }
  0x9d   :  { %2768 = vmatprep.subr.mxu0 %v3304_v20  ;;  %2782 = vmatprep.mubr.f32.mxu0 %v131_v61  ;;  %v1250_v61 = vsel %vm50_vm0, %v3449_v13, 0 }
  0x9e   :  { %2796 = vmatpush3.msra.mxu1 %v3299_v17  ;;  %2769 = vmatpush3.msra.mxu0 %v3304_v20  ;;  %v1329_v63 = vsub.f32 %v1250_v61, %v1250_v61 }
  0x9f   :  { %2797 = vmatprep.subr.mxu1 %v3301_v18  ;;  %2770 = vmatprep.subr.mxu0 %v3307_v21 }
  0xa0   :  { %2798 = vmatpush3.msra.mxu1 %v3301_v18  ;;  %2771 = vmatpush3.msra.mxu0 %v3307_v21  ;;  %v1330_v1 = vand.u32 4294901760, %v1329_v63 }
  0xa1   :  { %2799 = vmatprep.subr.mxu1 %v3324_v26  ;;  %2772 = vmatprep.subr.mxu0 %v3310_v22 }
  0xa2   :  { %2800 = vmatpush3.msra.mxu1 %v3324_v26  ;;  %2773 = vmatpush3.msra.mxu0 %v3310_v22  ;;  %v1839_v33 = vpop.permute.xlu1 %1838 }
  0xa3   :  { %2802 = vmatmul.mubr.f32.vlgmr.msra.gmra.mxu1 %v142_v12  ;;  %2823 = vmatprep.subr.mxu1 %v3285_v5  ;;  %vm1843_vm5 = vcmp.eq.s32.totalorder %v3421_v55, %v1839_v33 }
  0xa4   :  { %2774 = vmatprep.subr.mxu0 %v3319_v24  ;;  %2824 = vmatpush3.msra.mxu1 %v3285_v5  ;;  %v3499_v34 = vsel %vm1843_vm5, 1.0, %v3250_v58  ;;  %v1842_v35 = vpop.permute.xlu0 %1841 }
  0xa5   :  { %2839 = vmatprep.mubr.msk.f32.mxu1 %vm50_vm0, %v3427_v59  ;;  %2775 = vmatpush3.msra.mxu0 %v3319_v24  ;;  %vm1844_vm6 = vcmp.eq.s32.totalorder %v3421_v55, %v1842_v35  ;;  %v3559_v55 = vsub.f32 %v653_v53, %v653_v53 }
  0xa6   :  { %2825 = vmatprep.subr.mxu1 %v3287_v9  ;;  %2776 = vmatprep.subr.mxu0 %v3322_v25  ;;  %v3507_v37 = vsel %vm1844_vm6, 1.0, %v3250_v58  ;;  %v732_v58 = vand.u32 4294901760, %v731_v56 }
  0xa7   :  { %2826 = vmatpush3.msra.mxu1 %v3287_v9  ;;  %2777 = vmatpush3.msra.mxu0 %v3322_v25  ;;  %v740_v57 = vand.u32 4294901760, %v3559_v55 }
  0xa8   :  { %2827 = vmatprep.subr.mxu1 %v3289_v10  ;;  %2778 = vmatprep.subr.mxu0 %v3343_v32 }
  0xa9   :  { %2828 = vmatpush3.msra.mxu1 %v3289_v10  ;;  %2779 = vmatpush3.msra.mxu0 %v3343_v32 }
  0xaa   :  { %2829 = vmatprep.subr.mxu1 %v3291_v11  ;;  %2780 = vmatprep.subr.mxu0 %v3358_v39 }
  0xab   :  { %2830 = vmatpush3.msra.mxu1 %v3291_v11  ;;  %2781 = vmatpush3.msra.mxu0 %v3358_v39 }
  0xac   :  { %2831 = vmatprep.subr.mxu1 %v3296_v16  ;;  %2783 = vmatmul.mubr.f32.vlgmr.msra.gmra.mxu0 %v141_v3  ;;  %v1331_v3 = vsub.f32 %v1329_v63, %v1330_v1 }
  0xad   :  { %2804 = vmatprep.subr.mxu0 %v3316_v23  ;;  %2832 = vmatpush3.msra.mxu1 %v3296_v16 }
  0xae   :  { %2805 = vmatpush3.msra.mxu0 %v3316_v23  ;;  %2820 = vmatprep.mubr.msk.f32.mxu0 %vm50_vm0, %v3427_v59  ;;  %v741_v59 = vsub.f32 %v3559_v55, %v740_v57  ;;  %v1332_v6 = vand.u32 4294901760, %v1331_v3 }
  0xaf   :  { %2833 = vmatprep.subr.mxu1 %v3299_v17  ;;  %2806 = vmatprep.subr.mxu0 %v3327_v27 }
  0xb0   :  { %2834 = vmatpush3.msra.mxu1 %v3299_v17  ;;  %2807 = vmatpush3.msra.mxu0 %v3327_v27  ;;  %v742_v60 = vand.u32 4294901760, %v741_v59 }
  0xb1   :  { %2835 = vmatprep.subr.mxu1 %v3301_v18  ;;  %2808 = vmatprep.subr.mxu0 %v3330_v28 }
  0xb2   :  { %2836 = vmatpush3.msra.mxu1 %v3301_v18  ;;  %2809 = vmatpush3.msra.mxu0 %v3330_v28 }
  0xb3   :  { %2837 = vmatprep.subr.mxu1 %v3324_v26  ;;  %2810 = vmatprep.subr.mxu0 %v3333_v29 }
  0xb4   :  { %2838 = vmatpush3.msra.mxu1 %v3324_v26  ;;  %2811 = vmatpush3.msra.mxu0 %v3333_v29 }
  0xb5   :  { %2840 = vmatmul.mubr.msk.f32.vlgmr.msra.gmra.mxu1 %vm50_vm0, %v3437_v0  ;;  %2861 = vmatprep.subr.mxu1 %v3350_v36 }
  0xb6   :  { %2812 = vmatprep.subr.mxu0 %v3339_v31  ;;  %2862 = vmatpush3.msra.mxu1 %v3350_v36 }
  0xb7   :  { %2813 = vmatpush3.msra.mxu0 %v3339_v31  ;;  %2863 = vmatprep.subr.mxu1 %v3362_v40 }
  0xb8   :  { %2814 = vmatprep.subr.mxu0 %v3355_v38  ;;  %2864 = vmatpush3.msra.mxu1 %v3362_v40 }
  0xb9   :  { %2815 = vmatpush3.msra.mxu0 %v3355_v38  ;;  %2865 = vmatprep.subr.mxu1 %v3365_v41 }
  0xba   :  { %2816 = vmatprep.subr.mxu0 %v3370_v43  ;;  %2866 = vmatpush3.msra.mxu1 %v3365_v41 }
  0xbb   :  { %2817 = vmatpush3.msra.mxu0 %v3370_v43  ;;  %2867 = vmatprep.subr.mxu1 %v3376_v44 }
  0xbc   :  { %2818 = vmatprep.subr.mxu0 %v3381_v46  ;;  %2868 = vmatpush3.msra.mxu1 %v3376_v44 }
  0xbd   :  { %2819 = vmatpush3.msra.mxu0 %v3381_v46  ;;  %2869 = vmatprep.subr.mxu1 %v3387_v47 }
  0xbe   :  { %2821 = vmatmul.mubr.msk.f32.vlgmr.msra.gmra.mxu0 %vm50_vm0, %v3437_v0  ;;  %2842 = vmatprep.subr.mxu0 %v3285_v5  ;;  %v3674_v0 = vsub.f32 %v1253_v62, %v1253_v62 }
  0xbf   :  { %2870 = vmatpush3.msra.mxu1 %v3387_v47  ;;  %2843 = vmatpush3.msra.mxu0 %v3285_v5 }
  0xc0   :  { %2871 = vmatprep.subr.mxu1 %v3395_v49  ;;  %2844 = vmatprep.subr.mxu0 %v3287_v9  ;;  %v1340_v2 = vand.u32 4294901760, %v3674_v0 }
  0xc1   :  { %2872 = vmatpush3.msra.mxu1 %v3395_v49  ;;  %2845 = vmatpush3.msra.mxu0 %v3287_v9 }
  0xc2   :  { %2873 = vmatprep.subr.mxu1 %v3403_v51  ;;  %2846 = vmatprep.subr.mxu0 %v3289_v10  ;;  %v1341_v4 = vsub.f32 %v3674_v0, %v1340_v2 }
  0xc3   :  { %2874 = vmatpush3.msra.mxu1 %v3403_v51  ;;  %2877 = vmatprep.mubr.msk.f32.mxu1 %vm50_vm0, %v3523_v42 }
  0xc4   :  { %2847 = vmatpush3.msra.mxu0 %v3289_v10  ;;  %2875 = vmatprep.subr.mxu1 %v3409_v52  ;;  %v1342_v7 = vand.u32 4294901760, %v1341_v4 }
  0xc5   :  { %2848 = vmatprep.subr.mxu0 %v3291_v11  ;;  %2876 = vmatpush3.msra.mxu1 %v3409_v52 }
  0xc6   :  { %2849 = vmatpush3.msra.mxu0 %v3291_v11  ;;  %2878 = vmatmul.mubr.msk.f32.vlgmr.msra.gmra.mxu1 %vm50_vm0, %v3544_v50 }
  0xc7   :  { %2899 = vmatprep.subr.mxu1 %v3285_v5  ;;  %2850 = vmatprep.subr.mxu0 %v3296_v16 }
  0xc8   :  { %2900 = vmatpush3.msra.mxu1 %v3285_v5  ;;  %2851 = vmatpush3.msra.mxu0 %v3296_v16 }
  0xc9   :  { %2901 = vmatprep.subr.mxu1 %v3287_v9  ;;  %2915 = vmatprep.mubr.f32.mxu1 %v730_v54 }
  0xca   :  { %2852 = vmatprep.subr.mxu0 %v3299_v17  ;;  %2902 = vmatpush3.msra.mxu1 %v3287_v9 }
  0xcb   :  { %2853 = vmatpush3.msra.mxu0 %v3299_v17  ;;  %2858 = vmatprep.mubr.f32.mxu0 %v732_v58 }
  0xcc   :  { %2903 = vmatprep.subr.mxu1 %v3289_v10  ;;  %2854 = vmatprep.subr.mxu0 %v3301_v18 }
  0xcd   :  { %2904 = vmatpush3.msra.mxu1 %v3289_v10  ;;  %2855 = vmatpush3.msra.mxu0 %v3301_v18 }
  0xce   :  { %2905 = vmatprep.subr.mxu1 %v3291_v11  ;;  %2856 = vmatprep.subr.mxu0 %v3324_v26 }
  0xcf   :  { %2906 = vmatpush3.msra.mxu1 %v3291_v11  ;;  %2857 = vmatpush3.msra.mxu0 %v3324_v26 }
  0xd0   :  { %2907 = vmatprep.subr.mxu1 %v3296_v16  ;;  %2859 = vmatmul.mubr.f32.vlgmr.msra.gmra.mxu0 %v742_v60 }
  0xd1   :  { %2880 = vmatprep.subr.mxu0 %v3294_v15  ;;  %2908 = vmatpush3.msra.mxu1 %v3296_v16 }
  0xd2   :  { %2881 = vmatpush3.msra.mxu0 %v3294_v15  ;;  %2896 = vmatprep.mubr.f32.mxu0 %v729_v48 }
  0xd3   :  { %2909 = vmatprep.subr.mxu1 %v3299_v17  ;;  %2882 = vmatprep.subr.mxu0 %v3304_v20 }
  0xd4   :  { %2910 = vmatpush3.msra.mxu1 %v3299_v17  ;;  %2883 = vmatpush3.msra.mxu0 %v3304_v20 }
  0xd5   :  { %2911 = vmatprep.subr.mxu1 %v3301_v18  ;;  %2884 = vmatprep.subr.mxu0 %v3307_v21 }
  0xd6   :  { %2912 = vmatpush3.msra.mxu1 %v3301_v18  ;;  %2885 = vmatpush3.msra.mxu0 %v3307_v21 }
  0xd7   :  { %2913 = vmatprep.subr.mxu1 %v3324_v26  ;;  %2886 = vmatprep.subr.mxu0 %v3310_v22 }
  0xd8   :  { %2914 = vmatpush3.msra.mxu1 %v3324_v26  ;;  %2887 = vmatpush3.msra.mxu0 %v3310_v22 }
  0xd9   :  { %2916 = vmatmul.mubr.f32.vlgmr.msra.gmra.mxu1 %v740_v57  ;;  %2937 = vmatprep.subr.mxu1 %v3285_v5 }
  0xda   :  { %2888 = vmatprep.subr.mxu0 %v3319_v24  ;;  %2938 = vmatpush3.msra.mxu1 %v3285_v5 }
  0xdb   :  { %2953 = vmatprep.mubr.msk.f32.mxu1 %vm50_vm0, %v3523_v42  ;;  %2889 = vmatpush3.msra.mxu0 %v3319_v24 }
  0xdc   :  { %2939 = vmatprep.subr.mxu1 %v3287_v9  ;;  %2890 = vmatprep.subr.mxu0 %v3322_v25 }
  0xdd   :  { %2940 = vmatpush3.msra.mxu1 %v3287_v9  ;;  %2891 = vmatpush3.msra.mxu0 %v3322_v25 }
  0xde   :  { %2941 = vmatprep.subr.mxu1 %v3289_v10  ;;  %2892 = vmatprep.subr.mxu0 %v3343_v32 }
  0xdf   :  { %2942 = vmatpush3.msra.mxu1 %v3289_v10  ;;  %2893 = vmatpush3.msra.mxu0 %v3343_v32 }
  0xe0   :  { %2943 = vmatprep.subr.mxu1 %v3291_v11  ;;  %2894 = vmatprep.subr.mxu0 %v3358_v39 }
  0xe1   :  { %2944 = vmatpush3.msra.mxu1 %v3291_v11  ;;  %2895 = vmatpush3.msra.mxu0 %v3358_v39 }
  0xe2   :  { %2945 = vmatprep.subr.mxu1 %v3296_v16  ;;  %2897 = vmatmul.mubr.f32.vlgmr.msra.gmra.mxu0 %v3559_v55 }
  0xe3   :  { %2918 = vmatprep.subr.mxu0 %v3316_v23  ;;  %2946 = vmatpush3.msra.mxu1 %v3296_v16 }
  0xe4   :  { %2919 = vmatpush3.msra.mxu0 %v3316_v23  ;;  %2934 = vmatprep.mubr.msk.f32.mxu0 %vm50_vm0, %v3523_v42 }
  0xe5   :  { %2947 = vmatprep.subr.mxu1 %v3299_v17  ;;  %2920 = vmatprep.subr.mxu0 %v3327_v27 }
  0xe6   :  { %2948 = vmatpush3.msra.mxu1 %v3299_v17  ;;  %2921 = vmatpush3.msra.mxu0 %v3327_v27 }
  0xe7   :  { %2949 = vmatprep.subr.mxu1 %v3301_v18  ;;  %2922 = vmatprep.subr.mxu0 %v3330_v28 }
  0xe8   :  { %2950 = vmatpush3.msra.mxu1 %v3301_v18  ;;  %2923 = vmatpush3.msra.mxu0 %v3330_v28 }
  0xe9   :  { %2951 = vmatprep.subr.mxu1 %v3324_v26  ;;  %2924 = vmatprep.subr.mxu0 %v3333_v29 }
  0xea   :  { %2952 = vmatpush3.msra.mxu1 %v3324_v26  ;;  %2925 = vmatpush3.msra.mxu0 %v3333_v29 }
  0xeb   :  { %2954 = vmatmul.mubr.msk.f32.vlgmr.msra.gmra.mxu1 %vm50_vm0, %v3544_v50  ;;  %2975 = vmatprep.subr.mxu1 %v3350_v36 }
  0xec   :  { %2926 = vmatprep.subr.mxu0 %v3339_v31  ;;  %2976 = vmatpush3.msra.mxu1 %v3350_v36 }
  0xed   :  { %2927 = vmatpush3.msra.mxu0 %v3339_v31  ;;  %2977 = vmatprep.subr.mxu1 %v3362_v40 }
  0xee   :  { %2928 = vmatprep.subr.mxu0 %v3355_v38  ;;  %2978 = vmatpush3.msra.mxu1 %v3362_v40 }
  0xef   :  { %2929 = vmatpush3.msra.mxu0 %v3355_v38  ;;  %2979 = vmatprep.subr.mxu1 %v3365_v41 }
  0xf0   :  { %2930 = vmatprep.subr.mxu0 %v3370_v43  ;;  %2980 = vmatpush3.msra.mxu1 %v3365_v41 }
  0xf1   :  { %2931 = vmatpush3.msra.mxu0 %v3370_v43  ;;  %2981 = vmatprep.subr.mxu1 %v3376_v44 }
  0xf2   :  { %2932 = vmatprep.subr.mxu0 %v3381_v46  ;;  %2982 = vmatpush3.msra.mxu1 %v3376_v44 }
  0xf3   :  { %2933 = vmatpush3.msra.mxu0 %v3381_v46  ;;  %2983 = vmatprep.subr.mxu1 %v3387_v47 }
  0xf4   :  { %2935 = vmatmul.mubr.msk.f32.vlgmr.msra.gmra.mxu0 %vm50_vm0, %v3544_v50  ;;  %2956 = vmatprep.subr.mxu0 %v3285_v5 }
  0xf5   :  { %2984 = vmatpush3.msra.mxu1 %v3387_v47  ;;  %2957 = vmatpush3.msra.mxu0 %v3285_v5 }
  0xf6   :  { %2985 = vmatprep.subr.mxu1 %v3395_v49  ;;  %2958 = vmatprep.subr.mxu0 %v3287_v9 }
  0xf7   :  { %2986 = vmatpush3.msra.mxu1 %v3395_v49  ;;  %2959 = vmatpush3.msra.mxu0 %v3287_v9 }
  0xf8   :  { %2987 = vmatprep.subr.mxu1 %v3403_v51  ;;  %2960 = vmatprep.subr.mxu0 %v3289_v10 }
  0xf9   :  { %2988 = vmatpush3.msra.mxu1 %v3403_v51  ;;  %2961 = vmatpush3.msra.mxu0 %v3289_v10 }
  0xfa   :  { %2989 = vmatprep.subr.mxu1 %v3409_v52  ;;  %2962 = vmatprep.subr.mxu0 %v3291_v11 }
  0xfb   :  { %2990 = vmatpush3.msra.mxu1 %v3409_v52  ;;  %2991 = vmatprep.mubr.msk.f32.mxu1 %vm50_vm0, %v3449_v13 }
  0xfc   :  { %2963 = vmatpush3.msra.mxu0 %v3291_v11  ;;  %2992 = vmatmul.mubr.msk.f32.vlgmr.msra.gmra.mxu1 %vm50_vm0, %v3454_v19 }
  0xfd   :  { %3013 = vmatprep.subr.mxu1 %v3285_v5  ;;  %2964 = vmatprep.subr.mxu0 %v3296_v16 }
  0xfe   :  { %3014 = vmatpush3.msra.mxu1 %v3285_v5  ;;  %2965 = vmatpush3.msra.mxu0 %v3296_v16 }
  0xff   :  { %3015 = vmatprep.subr.mxu1 %v3287_v9  ;;  %2966 = vmatprep.subr.mxu0 %v3299_v17 }
 0x100   :  { %3016 = vmatpush3.msra.mxu1 %v3287_v9  ;;  %2967 = vmatpush3.msra.mxu0 %v3299_v17 }
 0x101   :  { %3017 = vmatprep.subr.mxu1 %v3289_v10  ;;  %2968 = vmatprep.subr.mxu0 %v3301_v18 }
 0x102   :  { %3018 = vmatpush3.msra.mxu1 %v3289_v10  ;;  %3029 = vmatprep.mubr.f32.mxu1 %v1330_v1 }
 0x103   :  { %2969 = vmatpush3.msra.mxu0 %v3301_v18  ;;  %3019 = vmatprep.subr.mxu1 %v3291_v11 }
 0x104   :  { %2970 = vmatprep.subr.mxu0 %v3324_v26  ;;  %2972 = vmatprep.mubr.f32.mxu0 %v1332_v6 }
 0x105   :  { %3020 = vmatpush3.msra.mxu1 %v3291_v11  ;;  %2971 = vmatpush3.msra.mxu0 %v3324_v26 }
 0x106   :  { %3021 = vmatprep.subr.mxu1 %v3296_v16  ;;  %2973 = vmatmul.mubr.f32.vlgmr.msra.gmra.mxu0 %v1342_v7 }
 0x107   :  { %2994 = vmatprep.subr.mxu0 %v3294_v15  ;;  %3022 = vmatpush3.msra.mxu1 %v3296_v16 }
 0x108   :  { %2995 = vmatpush3.msra.mxu0 %v3294_v15  ;;  %3010 = vmatprep.mubr.f32.mxu0 %v1329_v63 }
 0x109   :  { %3023 = vmatprep.subr.mxu1 %v3299_v17  ;;  %2996 = vmatprep.subr.mxu0 %v3304_v20 }
 0x10a   :  { %3024 = vmatpush3.msra.mxu1 %v3299_v17  ;;  %2997 = vmatpush3.msra.mxu0 %v3304_v20 }
 0x10b   :  { %3025 = vmatprep.subr.mxu1 %v3301_v18  ;;  %2998 = vmatprep.subr.mxu0 %v3307_v21 }
 0x10c   :  { %3026 = vmatpush3.msra.mxu1 %v3301_v18  ;;  %2999 = vmatpush3.msra.mxu0 %v3307_v21 }
 0x10d   :  { %3027 = vmatprep.subr.mxu1 %v3324_v26  ;;  %3000 = vmatprep.subr.mxu0 %v3310_v22 }
 0x10e   :  { %3028 = vmatpush3.msra.mxu1 %v3324_v26  ;;  %3001 = vmatpush3.msra.mxu0 %v3310_v22 }
 0x10f   :  { %3030 = vmatmul.mubr.f32.vlgmr.msra.gmra.mxu1 %v1340_v2  ;;  %3051 = vmatprep.subr.mxu1 %v3285_v5 }
 0x110   :  { %3002 = vmatprep.subr.mxu0 %v3319_v24  ;;  %3052 = vmatpush3.msra.mxu1 %v3285_v5 }
 0x111   :  { %3067 = vmatprep.mubr.msk.f32.mxu1 %vm50_vm0, %v3449_v13  ;;  %3003 = vmatpush3.msra.mxu0 %v3319_v24 }
 0x112   :  { %3053 = vmatprep.subr.mxu1 %v3287_v9  ;;  %3004 = vmatprep.subr.mxu0 %v3322_v25 }
 0x113   :  { %3054 = vmatpush3.msra.mxu1 %v3287_v9  ;;  %3005 = vmatpush3.msra.mxu0 %v3322_v25 }
 0x114   :  { %3055 = vmatprep.subr.mxu1 %v3289_v10  ;;  %3006 = vmatprep.subr.mxu0 %v3343_v32 }
 0x115   :  { %3056 = vmatpush3.msra.mxu1 %v3289_v10  ;;  %3007 = vmatpush3.msra.mxu0 %v3343_v32 }
 0x116   :  { %3057 = vmatprep.subr.mxu1 %v3291_v11  ;;  %3008 = vmatprep.subr.mxu0 %v3358_v39 }
 0x117   :  { %3058 = vmatpush3.msra.mxu1 %v3291_v11  ;;  %3009 = vmatpush3.msra.mxu0 %v3358_v39 }
 0x118   :  { %3059 = vmatprep.subr.mxu1 %v3296_v16  ;;  %3011 = vmatmul.mubr.f32.vlgmr.msra.gmra.mxu0 %v3674_v0 }
 0x119   :  { %3032 = vmatprep.subr.mxu0 %v3316_v23  ;;  %3060 = vmatpush3.msra.mxu1 %v3296_v16 }
 0x11a   :  { %3033 = vmatpush3.msra.mxu0 %v3316_v23  ;;  %3048 = vmatprep.mubr.msk.f32.mxu0 %vm50_vm0, %v3449_v13 }
 0x11b   :  { %3061 = vmatprep.subr.mxu1 %v3299_v17  ;;  %3034 = vmatprep.subr.mxu0 %v3327_v27 }
 0x11c   :  { %3062 = vmatpush3.msra.mxu1 %v3299_v17  ;;  %3035 = vmatpush3.msra.mxu0 %v3327_v27 }
 0x11d   :  { %3063 = vmatprep.subr.mxu1 %v3301_v18  ;;  %3036 = vmatprep.subr.mxu0 %v3330_v28 }
 0x11e   :  { %3064 = vmatpush3.msra.mxu1 %v3301_v18  ;;  %3037 = vmatpush3.msra.mxu0 %v3330_v28 }
 0x11f   :  { %3065 = vmatprep.subr.mxu1 %v3324_v26  ;;  %3038 = vmatprep.subr.mxu0 %v3333_v29 }
 0x120   :  { %3066 = vmatpush3.msra.mxu1 %v3324_v26  ;;  %3039 = vmatpush3.msra.mxu0 %v3333_v29 }
 0x121   :  { %3068 = vmatmul.mubr.msk.f32.vlgmr.msra.gmra.mxu1 %vm50_vm0, %v3454_v19  ;;  %3089 = vmatprep.subr.mxu1 %v3350_v36 }
 0x122   :  { %3040 = vmatprep.subr.mxu0 %v3339_v31  ;;  %3090 = vmatpush3.msra.mxu1 %v3350_v36  ;;  %v1850_v36 = vsel %vm50_vm0, %v3499_v34, 0 }
 0x123   :  { %3041 = vmatpush3.msra.mxu0 %v3339_v31  ;;  %3091 = vmatprep.subr.mxu1 %v3362_v40 }
 0x124   :  { %3042 = vmatprep.subr.mxu0 %v3355_v38  ;;  %3092 = vmatpush3.msra.mxu1 %v3362_v40  ;;  %v1853_v40 = vsel %vm50_vm0, %v3507_v37, 0 }
 0x125   :  { %3043 = vmatpush3.msra.mxu0 %v3355_v38  ;;  %3093 = vmatprep.subr.mxu1 %v3365_v41 }
 0x126   :  { %3044 = vmatprep.subr.mxu0 %v3370_v43  ;;  %3094 = vmatpush3.msra.mxu1 %v3365_v41  ;;  %v1929_v41 = vsub.f32 %v1850_v36, %v1850_v36 }
 0x127   :  { %3045 = vmatpush3.msra.mxu0 %v3370_v43  ;;  %3095 = vmatprep.subr.mxu1 %v3376_v44 }
 0x128   :  { %3046 = vmatprep.subr.mxu0 %v3381_v46  ;;  %3096 = vmatpush3.msra.mxu1 %v3376_v44  ;;  %v3791_v44 = vsub.f32 %v1853_v40, %v1853_v40  ;;  %v1930_v8 = vand.u32 4294901760, %v1929_v41 }
 0x129   :  { %3047 = vmatpush3.msra.mxu0 %v3381_v46  ;;  %3097 = vmatprep.subr.mxu1 %v3387_v47 }
 0x12a   :  { %3049 = vmatmul.mubr.msk.f32.vlgmr.msra.gmra.mxu0 %vm50_vm0, %v3454_v19  ;;  %3070 = vmatprep.subr.mxu0 %v3285_v5 }
 0x12b   :  { %3098 = vmatpush3.msra.mxu1 %v3387_v47  ;;  %3071 = vmatpush3.msra.mxu0 %v3285_v5  ;;  %v1940_v47 = vand.u32 4294901760, %v3791_v44 }
 0x12c   :  { %3099 = vmatprep.subr.mxu1 %v3395_v49  ;;  %3072 = vmatprep.subr.mxu0 %v3287_v9 }
 0x12d   :  { %3100 = vmatpush3.msra.mxu1 %v3395_v49  ;;  %3073 = vmatpush3.msra.mxu0 %v3287_v9  ;;  %v1931_v49 = vsub.f32 %v1929_v41, %v1930_v8 }
 0x12e   :  { %3101 = vmatprep.subr.mxu1 %v3403_v51  ;;  %3074 = vmatprep.subr.mxu0 %v3289_v10 }
 0x12f   :  { %3102 = vmatpush3.msra.mxu1 %v3403_v51  ;;  %3075 = vmatpush3.msra.mxu0 %v3289_v10  ;;  %v1941_v51 = vsub.f32 %v3791_v44, %v1940_v47 }
 0x130   :  { %3103 = vmatprep.subr.mxu1 %v3409_v52  ;;  %3076 = vmatprep.subr.mxu0 %v3291_v11 }
 0x131   :  { %3104 = vmatpush3.msra.mxu1 %v3409_v52  ;;  %3105 = vmatprep.mubr.msk.f32.mxu1 %vm50_vm0, %v3499_v34  ;;  %v1932_v52 = vand.u32 4294901760, %v1931_v49  ;;  %v1942_v12 = vand.u32 4294901760, %v1941_v51 }
 0x132   :  { %3077 = vmatpush3.msra.mxu0 %v3291_v11  ;;  %3106 = vmatmul.mubr.msk.f32.vlgmr.msra.gmra.mxu1 %vm50_vm0, %v3507_v37 }
 0x133   :  { %3127 = vmatprep.subr.mxu1 %v3285_v5  ;;  %3078 = vmatprep.subr.mxu0 %v3296_v16 }
 0x134   :  { %3128 = vmatpush3.msra.mxu1 %v3285_v5  ;;  %3079 = vmatpush3.msra.mxu0 %v3296_v16 }
 0x135   :  { %3129 = vmatprep.subr.mxu1 %v3287_v9  ;;  %3080 = vmatprep.subr.mxu0 %v3299_v17 }
 0x136   :  { %3130 = vmatpush3.msra.mxu1 %v3287_v9  ;;  %3081 = vmatpush3.msra.mxu0 %v3299_v17 }
 0x137   :  { %3131 = vmatprep.subr.mxu1 %v3289_v10  ;;  %3082 = vmatprep.subr.mxu0 %v3301_v18 }
 0x138   :  { %3132 = vmatpush3.msra.mxu1 %v3289_v10  ;;  %3143 = vmatprep.mubr.f32.mxu1 %v1930_v8 }
 0x139   :  { %3083 = vmatpush3.msra.mxu0 %v3301_v18  ;;  %3133 = vmatprep.subr.mxu1 %v3291_v11 }
 0x13a   :  { %3084 = vmatprep.subr.mxu0 %v3324_v26  ;;  %3086 = vmatprep.mubr.f32.mxu0 %v1932_v52 }
 0x13b   :  { %3134 = vmatpush3.msra.mxu1 %v3291_v11  ;;  %3085 = vmatpush3.msra.mxu0 %v3324_v26 }
 0x13c   :  { %3135 = vmatprep.subr.mxu1 %v3296_v16  ;;  %3087 = vmatmul.mubr.f32.vlgmr.msra.gmra.mxu0 %v1942_v12 }
 0x13d   :  { %3108 = vmatprep.subr.mxu0 %v3294_v15  ;;  %3136 = vmatpush3.msra.mxu1 %v3296_v16 }
 0x13e   :  { %3109 = vmatpush3.msra.mxu0 %v3294_v15  ;;  %3124 = vmatprep.mubr.f32.mxu0 %v1929_v41 }
 0x13f   :  { %3137 = vmatprep.subr.mxu1 %v3299_v17  ;;  %3110 = vmatprep.subr.mxu0 %v3304_v20 }
 0x140   :  { %3138 = vmatpush3.msra.mxu1 %v3299_v17  ;;  %3111 = vmatpush3.msra.mxu0 %v3304_v20 }
 0x141   :  { %3139 = vmatprep.subr.mxu1 %v3301_v18  ;;  %3112 = vmatprep.subr.mxu0 %v3307_v21 }
 0x142   :  { %3140 = vmatpush3.msra.mxu1 %v3301_v18  ;;  %3113 = vmatpush3.msra.mxu0 %v3307_v21 }
 0x143   :  { %3141 = vmatprep.subr.mxu1 %v3324_v26  ;;  %3114 = vmatprep.subr.mxu0 %v3310_v22 }
 0x144   :  { %3142 = vmatpush3.msra.mxu1 %v3324_v26  ;;  %3115 = vmatpush3.msra.mxu0 %v3310_v22 }
 0x145   :  { %3144 = vmatmul.mubr.f32.vlgmr.msra.gmra.mxu1 %v1940_v47  ;;  %3165 = vmatprep.subr.mxu1 %v3285_v5 }
 0x146   :  { %3116 = vmatprep.subr.mxu0 %v3319_v24  ;;  %3166 = vmatpush3.msra.mxu1 %v3285_v5 }
 0x147   :  { %3181 = vmatprep.mubr.msk.f32.mxu1 %vm50_vm0, %v3499_v34  ;;  %3117 = vmatpush3.msra.mxu0 %v3319_v24 }
 0x148   :  { %3167 = vmatprep.subr.mxu1 %v3287_v9  ;;  %3118 = vmatprep.subr.mxu0 %v3322_v25 }
 0x149   :  { %3168 = vmatpush3.msra.mxu1 %v3287_v9  ;;  %3119 = vmatpush3.msra.mxu0 %v3322_v25 }
 0x14a   :  { %3169 = vmatprep.subr.mxu1 %v3289_v10  ;;  %3120 = vmatprep.subr.mxu0 %v3343_v32 }
 0x14b   :  { %3170 = vmatpush3.msra.mxu1 %v3289_v10  ;;  %3121 = vmatpush3.msra.mxu0 %v3343_v32 }
 0x14c   :  { %3171 = vmatprep.subr.mxu1 %v3291_v11  ;;  %3122 = vmatprep.subr.mxu0 %v3358_v39 }
 0x14d   :  { %3172 = vmatpush3.msra.mxu1 %v3291_v11  ;;  %3123 = vmatpush3.msra.mxu0 %v3358_v39 }
 0x14e   :  { %3173 = vmatprep.subr.mxu1 %v3296_v16  ;;  %3125 = vmatmul.mubr.f32.vlgmr.msra.gmra.mxu0 %v3791_v44 }
 0x14f   :  { %3146 = vmatprep.subr.mxu0 %v3316_v23  ;;  %3174 = vmatpush3.msra.mxu1 %v3296_v16 }
 0x150   :  { %3147 = vmatpush3.msra.mxu0 %v3316_v23  ;;  %3162 = vmatprep.mubr.msk.f32.mxu0 %vm50_vm0, %v3499_v34 }
 0x151   :  { %3175 = vmatprep.subr.mxu1 %v3299_v17  ;;  %3148 = vmatprep.subr.mxu0 %v3327_v27 }
 0x152   :  { %3176 = vmatpush3.msra.mxu1 %v3299_v17  ;;  %3149 = vmatpush3.msra.mxu0 %v3327_v27  ;;  %v2765_v9 = vpop.f32.mrf.mxu1 }
 0x153   :  { %3177 = vmatprep.subr.mxu1 %v3301_v18  ;;  %3150 = vmatprep.subr.mxu0 %v3330_v28 }
 0x154   :  { %3178 = vmatpush3.msra.mxu1 %v3301_v18  ;;  %3151 = vmatpush3.msra.mxu0 %v3330_v28  ;;  %v257_v15 = vpop.f32.mrf.mxu1 }
 0x155   :  { %3179 = vmatprep.subr.mxu1 %v3324_v26  ;;  %3152 = vmatprep.subr.mxu0 %v3333_v29 }
 0x156   :  { %3180 = vmatpush3.msra.mxu1 %v3324_v26  ;;  %3153 = vmatpush3.msra.mxu0 %v3333_v29 }
 0x157   :  { %3182 = vmatmul.mubr.msk.f32.vlgmr.msra.gmra.mxu1 %vm50_vm0, %v3507_v37  ;;  %3154 = vmatprep.subr.mxu0 %v3339_v31 }
 0x158   :  { %3155 = vmatpush3.msra.mxu0 %v3339_v31 }
 0x159   :  { %3156 = vmatprep.subr.mxu0 %v3355_v38 }
 0x15a   :  { %3157 = vmatpush3.msra.mxu0 %v3355_v38 }
 0x15b   :  { %3158 = vmatprep.subr.mxu0 %v3370_v43  ;;  %v2746_v5 = vpop.f32.mrf.mxu0 }
 0x15c   :  { %3159 = vmatpush3.msra.mxu0 %v3370_v43  ;;  %v264_v54 = vadd.f32 %v2765_v9, %v2746_v5 }
 0x15d   :  { %3160 = vmatprep.subr.mxu0 %v3381_v46  ;;  %v136_v10 = vpop.f32.mrf.mxu0 }
 0x15e   :  { %3161 = vmatpush3.msra.mxu0 %v3381_v46  ;;  %v258_v59 = vadd.f32 %v257_v15, %v136_v10 }
 0x15f   :  { %3163 = vmatmul.mubr.msk.f32.vlgmr.msra.gmra.mxu0 %vm50_vm0, %v3507_v37 }
 0x163   :  { %v2803_v16 = vpop.f32.mrf.mxu1 }
 0x165   :  { %v439_v20 = vpop.f32.mrf.mxu1 }
 0x16c   :  { %v2784_v11 = vpop.f32.mrf.mxu0 }
 0x16d   :  { %v359_v60 = vadd.f32 %v2784_v11, %v264_v54 }
 0x16e   :  { %v351_v17 = vpop.f32.mrf.mxu0 }
 0x16f   :  { %v352_v2 = vadd.f32 %v351_v17, %v258_v59  ;;  %v448_v7 = vadd.f32 %v2803_v16, %v359_v60 }
 0x171   :  { %v440_v49 = vadd.f32 %v439_v20, %v352_v2 }
 0x175   :  { %v3890_v21 = vpop.f32.mrf.mxu1 }
 0x177   :  { %v3892_v24 = vpop.f32.mrf.mxu1 }
 0x17e   :  { %v2822_v18 = vpop.f32.mrf.mxu0 }
 0x17f   :  { %v549_v47 = vadd.f32 %v2822_v18, %v448_v7 }
 0x180   :  { %v542_v22 = vpop.f32.mrf.mxu0 }
 0x181   :  { %v543_v15 = vadd.f32 %v542_v22, %v440_v49  ;;  %v634_v16 = vadd.f32 %v3890_v21, %v549_v47 }
 0x183   :  { %v628_v18 = vadd.f32 %v3892_v24, %v543_v15 }
 0x186   :  { %v2879_v25 = vpop.f32.mrf.mxu1 }
 0x188   :  { %v855_v28 = vpop.f32.mrf.mxu1 }
 0x190   :  { %v2860_v23 = vpop.f32.mrf.mxu0 }
 0x191   :  { %v862_v53 = vadd.f32 %v2879_v25, %v2860_v23 }
 0x192   :  { %v734_v26 = vpop.f32.mrf.mxu0 }
 0x193   :  { %v856_v55 = vadd.f32 %v855_v28, %v734_v26 }
 0x199   :  { %v2917_v29 = vpop.f32.mrf.mxu1 }
 0x19b   :  { %v1037_v38 = vpop.f32.mrf.mxu1 }
 0x1a2   :  { %v2898_v27 = vpop.f32.mrf.mxu0 }
 0x1a3   :  { %v957_v57 = vadd.f32 %v2898_v27, %v862_v53 }
 0x1a4   :  { %v949_v31 = vpop.f32.mrf.mxu0 }
 0x1a5   :  { %v950_v61 = vadd.f32 %v949_v31, %v856_v55  ;;  %v1046_v4 = vadd.f32 %v2917_v29, %v957_v57 }
 0x1a7   :  { %v1038_v36 = vadd.f32 %v1037_v38, %v950_v61 }
 0x1ab   :  { %v2955_v39 = vpop.f32.mrf.mxu1 }
 0x1ad   :  { %v1225_v13 = vpop.f32.mrf.mxu1 }
 0x1b4   :  { %v2936_v32 = vpop.f32.mrf.mxu0 }
 0x1b5   :  { %v1147_v41 = vadd.f32 %v2936_v32, %v1046_v4 }
 0x1b6   :  { %v1140_v43 = vpop.f32.mrf.mxu0 }
 0x1b7   :  { %v1141_v51 = vadd.f32 %v1140_v43, %v1038_v36  ;;  %v1232_v17 = vadd.f32 %v2955_v39, %v1147_v41 }
 0x1b9   :  { %v1226_v27 = vadd.f32 %v1225_v13, %v1141_v51  ;;  %v1236_v32 = vmax.f32 %v634_v16, %v1232_v17 }
 0x1bc   :  { %v2993_v14 = vpop.f32.mrf.mxu1 }
 0x1be   :  { %v1455_v33 = vpop.f32.mrf.mxu1 }
 0x1c6   :  { %v2974_v46 = vpop.f32.mrf.mxu0 }
 0x1c7   :  { %v1462_v58 = vadd.f32 %v2993_v14, %v2974_v46 }
 0x1c8   :  { %v1334_v19 = vpop.f32.mrf.mxu0 }
 0x1c9   :  { %v1456_v0 = vadd.f32 %v1455_v33, %v1334_v19  ;;  %v1235_v19 = vmax.f32 %v628_v18, %v1226_v27 }
 0x1cf   :  { %v3031_v34 = vpop.f32.mrf.mxu1 }
 0x1d1   :  { %v1637_v42 = vpop.f32.mrf.mxu1 }
 0x1d8   :  { %v3012_v30 = vpop.f32.mrf.mxu0 }
 0x1d9   :  { %v1557_v1 = vadd.f32 %v3012_v30, %v1462_v58 }
 0x1da   :  { %v1549_v35 = vpop.f32.mrf.mxu0 }
 0x1db   :  { %v1550_v6 = vadd.f32 %v1549_v35, %v1456_v0  ;;  %v1646_v44 = vadd.f32 %v3031_v34, %v1557_v1 }
 0x1dd   :  { %v1638_v9 = vadd.f32 %v1637_v42, %v1550_v6 }
 0x1e1   :  { %v3069_v45 = vpop.f32.mrf.mxu1 }
 0x1e3   :  { %v1825_v56 = vpop.f32.mrf.mxu1 }
 0x1ea   :  { %v3050_v37 = vpop.f32.mrf.mxu0 }
 0x1eb   :  { %v1747_v5 = vadd.f32 %v3050_v37, %v1646_v44 }
 0x1ec   :  { %v1740_v48 = vpop.f32.mrf.mxu0 }
 0x1ed   :  { %v1741_v23 = vadd.f32 %v1740_v48, %v1638_v9  ;;  %v1832_v28 = vadd.f32 %v3069_v45, %v1747_v5 }
 0x1ef   :  { %v1826_v38 = vadd.f32 %v1825_v56, %v1741_v23  ;;  %v1836_v22 = vmax.f32 %v1236_v32, %v1832_v28 }
 0x1f1   :  { %v1835_v21 = vmax.f32 %v1235_v19, %v1826_v38 }
 0x1f2   :  { %v3107_v62 = vpop.f32.mrf.mxu1 }
 0x1f4   :  { %v2055_v40 = vpop.f32.mrf.mxu1 }
 0x1fc   :  { %v3088_v50 = vpop.f32.mrf.mxu0 }
 0x1fd   :  { %v2062_v8 = vadd.f32 %v3107_v62, %v3088_v50 }
 0x1fe   :  { %v1934_v63 = vpop.f32.mrf.mxu0 }
 0x1ff   :  { %v2056_v10 = vadd.f32 %v2055_v40, %v1934_v63 }
 0x205   :  { %v3145_v52 = vpop.f32.mrf.mxu1 }
 0x207   :  { %v2237_v26 = vpop.f32.mrf.mxu1 }
 0x20e   :  { %v3126_v3 = vpop.f32.mrf.mxu0 }
 0x20f   :  { %v2157_v11 = vadd.f32 %v3126_v3, %v2062_v8 }
 0x210   :  { %v2149_v12 = vpop.f32.mrf.mxu0 }
 0x211   :  { %v2150_v25 = vadd.f32 %v2149_v12, %v2056_v10  ;;  %v2246_v29 = vadd.f32 %v3145_v52, %v2157_v11 }
 0x213   :  { %v2238_v46 = vadd.f32 %v2237_v26, %v2150_v25 }
 0x217   :  { %v3183_v20 = vpop.f32.mrf.mxu1 }
 0x219   :  { %v2425_v33 = vpop.f32.mrf.mxu1 }
 0x21f   :  { %v3164_v31 = vpop.f32.mrf.mxu0 }
 0x220   :  { %v2347_v43 = vadd.f32 %v3164_v31, %v2246_v29 }
 0x221   :  { %v2340_v14 = vpop.f32.mrf.mxu0 }
 0x222   :  { %v2432_v39 = vadd.f32 %v3183_v20, %v2347_v43  ;;  %v2341_v30 = vadd.f32 %v2340_v14, %v2238_v46 }
 0x224   :  { %v2436_v13 = vmax.f32 %v1836_v22, %v2432_v39  ;;  %v2426_v34 = vadd.f32 %v2425_v33, %v2341_v30 }
 0x226   :  { %2438 = vst [vmem:[#allocation5 + $0x8] sm:$0xff] %v2436_v13  ;;  %v2435_v35 = vmax.f32 %v1835_v21, %v2426_v34 }
 0x228   :  { %2437 = vst [vmem:[#allocation5] sm:$0xff] %v2435_v35 }
 0x229   :  { %3230 = shalt.err (!%p3227_p9)
}
 0x22a   :  { %2450 = dma.vmem_to_hbm [thread:$0]  %s2445_s1, 256, %s3904_s2, [#allocation4], %s3244_s12, %s3244_s12, %s3245_s13  }
 0x22b   :  { %3241 = dma.done.wait [#allocation4], 256  }
 0x22c   :  { %3242 = vsyncadd [#allocation4], 4294967040 }
 0x22d   :  { %2454 = vsyncpa [#allocation3], 1 }
 0x22e   :  { %2455 = vsyncpa [#allocation4], 1 }

// kernel: tpu_custom_call.1
= control target key start
LH: loop header
LB: loop body
LE: loop exit
PB: predicated region body
PF: predicated region fallthrough
CT: control target
= control target key end

     0   :  { %7 = vsyncpa [#allocation3], 0  ;;  %s3902_s0 = inlined_call_operand.vmem [shape: s32[16,4], index: 0, kind: input, shape index: {}]   ;;  %s3903_s1 = inlined_call_operand.hbm [shape: f32[64,128], index: 1, kind: input, shape index: {}]   ;;  %s3904_s2 = inlined_call_operand.hbm [shape: f32[16,128], index: 2, kind: output, shape index: {}]  }
   0x1   :  { %8 = vsyncpa [#allocation4], 0  ;;  %s3243_s9 = smov [#allocation2]  }
   0x2   :  { %s16_s10 = sshll.u32 %s3243_s9, 4  ;;  %s17_s10 = int_to_ptr.vmem [resolvable:$true] %s16_s10 }
   0x3   :  { %s3207_s11 = scalar_lea.vmem %s17_s10, 1024  ;;  %p3212_p1 = scmp.lt.s32.totalorder %s17_s10, %s17_s10 }
   0x4   :  { %p3208_p0 = scmp.ne.s32.totalorder %s17_s10, %s3207_s11  ;;  %p3213_p2 = scmp.lt.s32.totalorder %s3207_s11, %s3207_s11 }
   0x6   :  { %p3214_p3 = por %p3213_p2, %p3212_p1 }
   0x8   :  { %p3215_p4 = pnand %p3214_p3, %p3208_p0 }
   0xa   :  { %3218 = shalt.err (!%p3215_p4)
}
   0xb   :  { %s3244_s12 = smov 128   ;;  %s3245_s13 = smov 8  }
   0xc   :  { %22 = dma.hbm_to_vmem [thread:$0]  %s3903_s1, 1024, %s17_s10, [#allocation3], %s3244_s12, %s3244_s12, %s3245_s13  }
   0xd   :  { %3239 = dma.done.wait [#allocation3], 1024  }
   0xe   :  { %3240 = vsyncadd [#allocation3], 4294966272  ;;  %v3246_v0 = vmov 0   ;;  %v3247_v1 = vmov 1   ;;  %v3276_v2 = vld [vmem:[%s3902_s0] sm:$0xff]  ;;  %v3281_v3 = vld [vmem:[%s3902_s0 + $0x8] sm:$0xff]  ;;  %v36_v54 = vlaneseq }
   0xf   :  { %3193 = vset.pattern.permute.xlu0 %v3246_v0  ;;  %3194 = vset.pattern.permute.xlu1 %v3247_v1  ;;  %v35_v4 = vld [vmem:[#allocation2 + $0x38] sm:$0xff]  ;;  %v34_v6 = vld [vmem:[#allocation2 + $0x30] sm:$0xff]  ;;  %v33_v7 = vld [vmem:[#allocation2 + $0x28] sm:$0xff]  ;;  %v3248_v35 = vmov 2   ;;  %v3249_v53 = vmov 3   ;;  %vm50_vm0 = vcmask 523264  }
  0x10   :  { %39 = vperm.xlu0 %3193, %v3276_v2   ;;  %638 = vperm.xlu1 %3194, %v3276_v2   ;;  %v3285_v5 = vand.u32 4294901760, %v35_v4  ;;  %v32_v8 = vld [vmem:[#allocation2 + $0x20] sm:$0xff]  ;;  %v3287_v9 = vand.u32 4294901760, %v34_v6  ;;  %v3289_v10 = vand.u32 4294901760, %v33_v7  ;;  %v31_v12 = vld [vmem:[#allocation2 + $0x18] sm:$0xff]  ;;  %v30_v13 = vld [vmem:[#allocation2 + $0x10] sm:$0xff] }
  0x11   :  { %v3291_v11 = vand.u32 4294901760, %v32_v8  ;;  %v29_v14 = vld [vmem:[#allocation2 + $0x8] sm:$0xff]  ;;  %v3296_v16 = vand.u32 4294901760, %v31_v12  ;;  %v3299_v17 = vand.u32 4294901760, %v30_v13  ;;  %v28_v19 = vld [vmem:[#allocation2] sm:$0xff]  ;;  %v3421_v55 = vand.u32 127, %v36_v54 }
  0x12   :  { %v3294_v15 = vsub.f32 %v35_v4, %v3285_v5  ;;  %2728 = vmatprep.subr.mxu0 %v3285_v5  ;;  %v3301_v18 = vand.u32 4294901760, %v29_v14  ;;  %v3304_v20 = vsub.f32 %v34_v6, %v3287_v9  ;;  %v3307_v21 = vsub.f32 %v33_v7, %v3289_v10  ;;  %s3251_s0 = smov [#allocation5]  }
  0x13   :  { %v3310_v22 = vsub.f32 %v32_v8, %v3291_v11  ;;  %2729 = vmatpush3.msra.mxu0 %v3285_v5  ;;  %v3319_v24 = vsub.f32 %v31_v12, %v3296_v16  ;;  %v3322_v25 = vsub.f32 %v30_v13, %v3299_v17  ;;  %v3324_v26 = vand.u32 4294901760, %v28_v19  ;;  %s2444_s1 = sshll.u32 %s3251_s0, 4  ;;  %s2445_s1 = int_to_ptr.vmem [resolvable:$true] %s2444_s1 }
  0x14   :  { %42 = vperm.xlu0 %3193, %v3281_v3   ;;  %641 = vperm.xlu1 %3194, %v3281_v3   ;;  %v3316_v23 = vand.u32 4294901760, %v3294_v15  ;;  %v3327_v27 = vand.u32 4294901760, %v3304_v20  ;;  %v3330_v28 = vand.u32 4294901760, %v3307_v21  ;;  %v3343_v32 = vsub.f32 %v29_v14, %v3301_v18  ;;  %s3219_s20 = scalar_lea.vmem %s2445_s1, 256  ;;  %p3224_p6 = scmp.lt.s32.totalorder %s2445_s1, %s2445_s1 }
  0x15   :  { %v3333_v29 = vand.u32 4294901760, %v3310_v22  ;;  %2730 = vmatprep.subr.mxu0 %v3287_v9  ;;  %v3339_v31 = vand.u32 4294901760, %v3319_v24  ;;  %v3355_v38 = vand.u32 4294901760, %v3322_v25  ;;  %v3358_v39 = vsub.f32 %v28_v19, %v3324_v26  ;;  %p3220_p5 = scmp.ne.s32.totalorder %s2445_s1, %s3219_s20  ;;  %p3225_p7 = scmp.lt.s32.totalorder %s3219_s20, %s3219_s20 }
  0x16   :  { %v170_v30 = vsub.f32 %v3294_v15, %v3316_v23  ;;  %2731 = vmatpush3.msra.mxu0 %v3287_v9  ;;  %v177_v33 = vsub.f32 %v3304_v20, %v3327_v27  ;;  %v184_v34 = vsub.f32 %v3307_v21, %v3330_v28  ;;  %v3370_v43 = vand.u32 4294901760, %v3343_v32 }
  0x17   :  { %2732 = vmatprep.subr.mxu0 %v3289_v10  ;;  %v191_v37 = vsub.f32 %v3310_v22, %v3333_v29  ;;  %v198_v42 = vsub.f32 %v3319_v24, %v3339_v31  ;;  %v205_v45 = vsub.f32 %v3322_v25, %v3355_v38  ;;  %v3381_v46 = vand.u32 4294901760, %v3358_v39  ;;  %p3226_p8 = por %p3225_p7, %p3224_p6 }
  0x18   :  { %3195 = vset.pattern.permute.xlu0 %v3248_v35  ;;  %3196 = vset.pattern.permute.xlu1 %v3248_v35  ;;  %v3350_v36 = vand.u32 4294901760, %v170_v30  ;;  %v3362_v40 = vand.u32 4294901760, %v177_v33  ;;  %v3365_v41 = vand.u32 4294901760, %v184_v34  ;;  %v212_v48 = vsub.f32 %v3343_v32, %v3370_v43 }
  0x19   :  { %1238 = vperm.xlu0 %3195, %v3276_v2   ;;  %1241 = vperm.xlu1 %3196, %v3281_v3   ;;  %v3376_v44 = vand.u32 4294901760, %v191_v37  ;;  %v3387_v47 = vand.u32 4294901760, %v198_v42  ;;  %v3395_v49 = vand.u32 4294901760, %v205_v45  ;;  %v219_v50 = vsub.f32 %v3358_v39, %v3381_v46  ;;  %p3227_p9 = pnand %p3226_p8, %p3220_p5 }
  0x1a   :  { %2747 = vmatprep.subr.mxu1 %v3350_v36  ;;  %2733 = vmatpush3.msra.mxu0 %v3289_v10  ;;  %v3403_v51 = vand.u32 4294901760, %v212_v48  ;;  %v3250_v58 = vmov 0.0  }
  0x1b   :  { %2748 = vmatpush3.msra.mxu1 %v3350_v36  ;;  %2734 = vmatprep.subr.mxu0 %v3291_v11  ;;  %v3409_v52 = vand.u32 4294901760, %v219_v50 }
  0x1c   :  { %2749 = vmatprep.subr.mxu1 %v3362_v40  ;;  %2735 = vmatpush3.msra.mxu0 %v3291_v11 }
  0x1d   :  { %2750 = vmatpush3.msra.mxu1 %v3362_v40  ;;  %2736 = vmatprep.subr.mxu0 %v3296_v16 }
  0x1e   :  { %2751 = vmatprep.subr.mxu1 %v3365_v41  ;;  %2737 = vmatpush3.msra.mxu0 %v3296_v16 }
  0x1f   :  { %2752 = vmatpush3.msra.mxu1 %v3365_v41  ;;  %2738 = vmatprep.subr.mxu0 %v3299_v17 }
  0x20   :  { %2753 = vmatprep.subr.mxu1 %v3376_v44  ;;  %2739 = vmatpush3.msra.mxu0 %v3299_v17 }
  0x21   :  { %2754 = vmatpush3.msra.mxu1 %v3376_v44  ;;  %2740 = vmatprep.subr.mxu0 %v3301_v18 }
  0x22   :  { %2755 = vmatprep.subr.mxu1 %v3387_v47  ;;  %2741 = vmatpush3.msra.mxu0 %v3301_v18 }
  0x23   :  { %2756 = vmatpush3.msra.mxu1 %v3387_v47  ;;  %2742 = vmatprep.subr.mxu0 %v3324_v26 }
  0x24   :  { %2757 = vmatprep.subr.mxu1 %v3395_v49  ;;  %2743 = vmatpush3.msra.mxu0 %v3324_v26 }
  0x25   :  { %2758 = vmatpush3.msra.mxu1 %v3395_v49  ;;  %2766 = vmatprep.subr.mxu0 %v3294_v15 }
  0x26   :  { %2759 = vmatprep.subr.mxu1 %v3403_v51  ;;  %3197 = vset.pattern.permute.xlu1 %v3249_v53 }
  0x27   :  { %2760 = vmatpush3.msra.mxu1 %v3403_v51  ;;  %1838 = vperm.xlu1 %3197, %v3276_v2  }
  0x28   :  { %2761 = vmatprep.subr.mxu1 %v3409_v52  ;;  %3198 = vset.pattern.permute.xlu0 %v3249_v53 }
  0x29   :  { %2762 = vmatpush3.msra.mxu1 %v3409_v52  ;;  %1841 = vperm.xlu0 %3198, %v3281_v3  }
  0x2a   :  { %2785 = vmatprep.subr.mxu1 %v3285_v5 }
  0x8b   :  { %v40_v56 = vpop.permute.xlu0 %39  ;;  %v3423_v57 = vpop.permute.xlu1 %638 }
  0x8c   :  { %vm44_vm1 = vcmp.eq.s32.totalorder %v3421_v55, %v40_v56  ;;  %vm643_vm7 = vcmp.eq.s32.totalorder %v3421_v55, %v3423_v57 }
  0x8d   :  { %v3427_v59 = vsel %vm44_vm1, 1.0, %v3250_v58  ;;  %v3523_v42 = vsel %vm643_vm7, 1.0, %v3250_v58 }
  0x8e   :  { %v52_v60 = vsel %vm50_vm0, %v3427_v59, 0  ;;  %2763 = vmatprep.mubr.msk.f32.mxu1 %vm50_vm0, %v3427_v59  ;;  %v650_v45 = vsel %vm50_vm0, %v3523_v42, 0 }
  0x8f   :  { %v131_v61 = vsub.f32 %v52_v60, %v52_v60  ;;  %v43_v62 = vpop.permute.xlu0 %42  ;;  %v3434_v63 = vpop.permute.xlu1 %641  ;;  %v729_v48 = vsub.f32 %v650_v45, %v650_v45 }
  0x90   :  { %vm45_vm2 = vcmp.eq.s32.totalorder %v3421_v55, %v43_v62  ;;  %vm644_vm8 = vcmp.eq.s32.totalorder %v3421_v55, %v3434_v63 }
  0x91   :  { %v3437_v0 = vsel %vm45_vm2, 1.0, %v3250_v58  ;;  %v132_v1 = vand.u32 4294901760, %v131_v61  ;;  %v3544_v50 = vsel %vm644_vm8, 1.0, %v3250_v58  ;;  %v730_v54 = vand.u32 4294901760, %v729_v48 }
  0x92   :  { %v55_v2 = vsel %vm50_vm0, %v3437_v0, 0  ;;  %2764 = vmatmul.mubr.msk.f32.vlgmr.msra.gmra.mxu1 %vm50_vm0, %v3437_v0  ;;  %v653_v53 = vsel %vm50_vm0, %v3544_v50, 0 }
  0x93   :  { %v141_v3 = vsub.f32 %v55_v2, %v55_v2  ;;  %2786 = vmatpush3.msra.mxu1 %v3285_v5  ;;  %2801 = vmatprep.mubr.f32.mxu1 %v132_v1  ;;  %v133_v4 = vsub.f32 %v131_v61, %v132_v1  ;;  %v731_v56 = vsub.f32 %v729_v48, %v730_v54 }
  0x94   :  { %2787 = vmatprep.subr.mxu1 %v3287_v9  ;;  %v1239_v6 = vpop.permute.xlu0 %1238  ;;  %v1242_v7 = vpop.permute.xlu1 %1241 }
  0x95   :  { %2788 = vmatpush3.msra.mxu1 %v3287_v9  ;;  %v134_v8 = vand.u32 4294901760, %v133_v4  ;;  %v142_v12 = vand.u32 4294901760, %v141_v3  ;;  %vm1243_vm3 = vcmp.eq.s32.totalorder %v3421_v55, %v1239_v6  ;;  %vm1244_vm4 = vcmp.eq.s32.totalorder %v3421_v55, %v1242_v7 }
  0x96   :  { %2789 = vmatprep.subr.mxu1 %v3289_v10  ;;  %v3449_v13 = vsel %vm1243_vm3, 1.0, %v3250_v58  ;;  %v3454_v19 = vsel %vm1244_vm4, 1.0, %v3250_v58 }
  0x97   :  { %2790 = vmatpush3.msra.mxu1 %v3289_v10  ;;  %2744 = vmatprep.mubr.f32.mxu0 %v134_v8  ;;  %v143_v14 = vsub.f32 %v141_v3, %v142_v12  ;;  %v1253_v62 = vsel %vm50_vm0, %v3454_v19, 0 }
  0x98   :  { %2791 = vmatprep.subr.mxu1 %v3291_v11 }
  0x99   :  { %2792 = vmatpush3.msra.mxu1 %v3291_v11  ;;  %v144_v30 = vand.u32 4294901760, %v143_v14 }
  0x9a   :  { %2793 = vmatprep.subr.mxu1 %v3296_v16 }
  0x9b   :  { %2794 = vmatpush3.msra.mxu1 %v3296_v16  ;;  %2745 = vmatmul.mubr.f32.vlgmr.msra.gmra.mxu0 %v144_v30 }
  0x9c   :  { %2767 = vmatpush3.msra.mxu0 %v3294_v15  ;;  %2795 = vmatprep.subr.mxu1 %v3299_v17 }
  0x9d   :  { %2768 = vmatprep.subr.mxu0 %v3304_v20  ;;  %2782 = vmatprep.mubr.f32.mxu0 %v131_v61  ;;  %v1250_v61 = vsel %vm50_vm0, %v3449_v13, 0 }
  0x9e   :  { %2796 = vmatpush3.msra.mxu1 %v3299_v17  ;;  %2769 = vmatpush3.msra.mxu0 %v3304_v20  ;;  %v1329_v63 = vsub.f32 %v1250_v61, %v1250_v61 }
  0x9f   :  { %2797 = vmatprep.subr.mxu1 %v3301_v18  ;;  %2770 = vmatprep.subr.mxu0 %v3307_v21 }
  0xa0   :  { %2798 = vmatpush3.msra.mxu1 %v3301_v18  ;;  %2771 = vmatpush3.msra.mxu0 %v3307_v21  ;;  %v1330_v1 = vand.u32 4294901760, %v1329_v63 }
  0xa1   :  { %2799 = vmatprep.subr.mxu1 %v3324_v26  ;;  %2772 = vmatprep.subr.mxu0 %v3310_v22 }
  0xa2   :  { %2800 = vmatpush3.msra.mxu1 %v3324_v26  ;;  %2773 = vmatpush3.msra.mxu0 %v3310_v22  ;;  %v1839_v33 = vpop.permute.xlu1 %1838 }
  0xa3   :  { %2802 = vmatmul.mubr.f32.vlgmr.msra.gmra.mxu1 %v142_v12  ;;  %2823 = vmatprep.subr.mxu1 %v3285_v5  ;;  %vm1843_vm5 = vcmp.eq.s32.totalorder %v3421_v55, %v1839_v33 }
  0xa4   :  { %2774 = vmatprep.subr.mxu0 %v3319_v24  ;;  %2824 = vmatpush3.msra.mxu1 %v3285_v5  ;;  %v3499_v34 = vsel %vm1843_vm5, 1.0, %v3250_v58  ;;  %v1842_v35 = vpop.permute.xlu0 %1841 }
  0xa5   :  { %2839 = vmatprep.mubr.msk.f32.mxu1 %vm50_vm0, %v3427_v59  ;;  %2775 = vmatpush3.msra.mxu0 %v3319_v24  ;;  %vm1844_vm6 = vcmp.eq.s32.totalorder %v3421_v55, %v1842_v35  ;;  %v3559_v55 = vsub.f32 %v653_v53, %v653_v53 }
  0xa6   :  { %2825 = vmatprep.subr.mxu1 %v3287_v9  ;;  %2776 = vmatprep.subr.mxu0 %v3322_v25  ;;  %v3507_v37 = vsel %vm1844_vm6, 1.0, %v3250_v58  ;;  %v732_v58 = vand.u32 4294901760, %v731_v56 }
  0xa7   :  { %2826 = vmatpush3.msra.mxu1 %v3287_v9  ;;  %2777 = vmatpush3.msra.mxu0 %v3322_v25  ;;  %v740_v57 = vand.u32 4294901760, %v3559_v55 }
  0xa8   :  { %2827 = vmatprep.subr.mxu1 %v3289_v10  ;;  %2778 = vmatprep.subr.mxu0 %v3343_v32 }
  0xa9   :  { %2828 = vmatpush3.msra.mxu1 %v3289_v10  ;;  %2779 = vmatpush3.msra.mxu0 %v3343_v32 }
  0xaa   :  { %2829 = vmatprep.subr.mxu1 %v3291_v11  ;;  %2780 = vmatprep.subr.mxu0 %v3358_v39 }
  0xab   :  { %2830 = vmatpush3.msra.mxu1 %v3291_v11  ;;  %2781 = vmatpush3.msra.mxu0 %v3358_v39 }
  0xac   :  { %2831 = vmatprep.subr.mxu1 %v3296_v16  ;;  %2783 = vmatmul.mubr.f32.vlgmr.msra.gmra.mxu0 %v141_v3  ;;  %v1331_v3 = vsub.f32 %v1329_v63, %v1330_v1 }
  0xad   :  { %2804 = vmatprep.subr.mxu0 %v3316_v23  ;;  %2832 = vmatpush3.msra.mxu1 %v3296_v16 }
  0xae   :  { %2805 = vmatpush3.msra.mxu0 %v3316_v23  ;;  %2820 = vmatprep.mubr.msk.f32.mxu0 %vm50_vm0, %v3427_v59  ;;  %v741_v59 = vsub.f32 %v3559_v55, %v740_v57  ;;  %v1332_v6 = vand.u32 4294901760, %v1331_v3 }
  0xaf   :  { %2833 = vmatprep.subr.mxu1 %v3299_v17  ;;  %2806 = vmatprep.subr.mxu0 %v3327_v27 }
  0xb0   :  { %2834 = vmatpush3.msra.mxu1 %v3299_v17  ;;  %2807 = vmatpush3.msra.mxu0 %v3327_v27  ;;  %v742_v60 = vand.u32 4294901760, %v741_v59 }
  0xb1   :  { %2835 = vmatprep.subr.mxu1 %v3301_v18  ;;  %2808 = vmatprep.subr.mxu0 %v3330_v28 }
  0xb2   :  { %2836 = vmatpush3.msra.mxu1 %v3301_v18  ;;  %2809 = vmatpush3.msra.mxu0 %v3330_v28 }
  0xb3   :  { %2837 = vmatprep.subr.mxu1 %v3324_v26  ;;  %2810 = vmatprep.subr.mxu0 %v3333_v29 }
  0xb4   :  { %2838 = vmatpush3.msra.mxu1 %v3324_v26  ;;  %2811 = vmatpush3.msra.mxu0 %v3333_v29 }
  0xb5   :  { %2840 = vmatmul.mubr.msk.f32.vlgmr.msra.gmra.mxu1 %vm50_vm0, %v3437_v0  ;;  %2861 = vmatprep.subr.mxu1 %v3350_v36 }
  0xb6   :  { %2812 = vmatprep.subr.mxu0 %v3339_v31  ;;  %2862 = vmatpush3.msra.mxu1 %v3350_v36 }
  0xb7   :  { %2813 = vmatpush3.msra.mxu0 %v3339_v31  ;;  %2863 = vmatprep.subr.mxu1 %v3362_v40 }
  0xb8   :  { %2814 = vmatprep.subr.mxu0 %v3355_v38  ;;  %2864 = vmatpush3.msra.mxu1 %v3362_v40 }
  0xb9   :  { %2815 = vmatpush3.msra.mxu0 %v3355_v38  ;;  %2865 = vmatprep.subr.mxu1 %v3365_v41 }
  0xba   :  { %2816 = vmatprep.subr.mxu0 %v3370_v43  ;;  %2866 = vmatpush3.msra.mxu1 %v3365_v41 }
  0xbb   :  { %2817 = vmatpush3.msra.mxu0 %v3370_v43  ;;  %2867 = vmatprep.subr.mxu1 %v3376_v44 }
  0xbc   :  { %2818 = vmatprep.subr.mxu0 %v3381_v46  ;;  %2868 = vmatpush3.msra.mxu1 %v3376_v44 }
  0xbd   :  { %2819 = vmatpush3.msra.mxu0 %v3381_v46  ;;  %2869 = vmatprep.subr.mxu1 %v3387_v47 }
  0xbe   :  { %2821 = vmatmul.mubr.msk.f32.vlgmr.msra.gmra.mxu0 %vm50_vm0, %v3437_v0  ;;  %2842 = vmatprep.subr.mxu0 %v3285_v5  ;;  %v3674_v0 = vsub.f32 %v1253_v62, %v1253_v62 }
  0xbf   :  { %2870 = vmatpush3.msra.mxu1 %v3387_v47  ;;  %2843 = vmatpush3.msra.mxu0 %v3285_v5 }
  0xc0   :  { %2871 = vmatprep.subr.mxu1 %v3395_v49  ;;  %2844 = vmatprep.subr.mxu0 %v3287_v9  ;;  %v1340_v2 = vand.u32 4294901760, %v3674_v0 }
  0xc1   :  { %2872 = vmatpush3.msra.mxu1 %v3395_v49  ;;  %2845 = vmatpush3.msra.mxu0 %v3287_v9 }
  0xc2   :  { %2873 = vmatprep.subr.mxu1 %v3403_v51  ;;  %2846 = vmatprep.subr.mxu0 %v3289_v10  ;;  %v1341_v4 = vsub.f32 %v3674_v0, %v1340_v2 }
  0xc3   :  { %2874 = vmatpush3.msra.mxu1 %v3403_v51  ;;  %2877 = vmatprep.mubr.msk.f32.mxu1 %vm50_vm0, %v3523_v42 }
  0xc4   :  { %2847 = vmatpush3.msra.mxu0 %v3289_v10  ;;  %2875 = vmatprep.subr.mxu1 %v3409_v52  ;;  %v1342_v7 = vand.u32 4294901760, %v1341_v4 }
  0xc5   :  { %2848 = vmatprep.subr.mxu0 %v3291_v11  ;;  %2876 = vmatpush3.msra.mxu1 %v3409_v52 }
  0xc6   :  { %2849 = vmatpush3.msra.mxu0 %v3291_v11  ;;  %2878 = vmatmul.mubr.msk.f32.vlgmr.msra.gmra.mxu1 %vm50_vm0, %v3544_v50 }
  0xc7   :  { %2899 = vmatprep.subr.mxu1 %v3285_v5  ;;  %2850 = vmatprep.subr.mxu0 %v3296_v16 }
  0xc8   :  { %2900 = vmatpush3.msra.mxu1 %v3285_v5  ;;  %2851 = vmatpush3.msra.mxu0 %v3296_v16 }
  0xc9   :  { %2901 = vmatprep.subr.mxu1 %v3287_v9  ;;  %2915 = vmatprep.mubr.f32.mxu1 %v730_v54 }
  0xca   :  { %2852 = vmatprep.subr.mxu0 %v3299_v17  ;;  %2902 = vmatpush3.msra.mxu1 %v3287_v9 }
  0xcb   :  { %2853 = vmatpush3.msra.mxu0 %v3299_v17  ;;  %2858 = vmatprep.mubr.f32.mxu0 %v732_v58 }
  0xcc   :  { %2903 = vmatprep.subr.mxu1 %v3289_v10  ;;  %2854 = vmatprep.subr.mxu0 %v3301_v18 }
  0xcd   :  { %2904 = vmatpush3.msra.mxu1 %v3289_v10  ;;  %2855 = vmatpush3.msra.mxu0 %v3301_v18 }
  0xce   :  { %2905 = vmatprep.subr.mxu1 %v3291_v11  ;;  %2856 = vmatprep.subr.mxu0 %v3324_v26 }
  0xcf   :  { %2906 = vmatpush3.msra.mxu1 %v3291_v11  ;;  %2857 = vmatpush3.msra.mxu0 %v3324_v26 }
  0xd0   :  { %2907 = vmatprep.subr.mxu1 %v3296_v16  ;;  %2859 = vmatmul.mubr.f32.vlgmr.msra.gmra.mxu0 %v742_v60 }
  0xd1   :  { %2880 = vmatprep.subr.mxu0 %v3294_v15  ;;  %2908 = vmatpush3.msra.mxu1 %v3296_v16 }
  0xd2   :  { %2881 = vmatpush3.msra.mxu0 %v3294_v15  ;;  %2896 = vmatprep.mubr.f32.mxu0 %v729_v48 }
  0xd3   :  { %2909 = vmatprep.subr.mxu1 %v3299_v17  ;;  %2882 = vmatprep.subr.mxu0 %v3304_v20 }
  0xd4   :  { %2910 = vmatpush3.msra.mxu1 %v3299_v17  ;;  %2883 = vmatpush3.msra.mxu0 %v3304_v20 }
  0xd5   :  { %2911 = vmatprep.subr.mxu1 %v3301_v18  ;;  %2884 = vmatprep.subr.mxu0 %v3307_v21 }
  0xd6   :  { %2912 = vmatpush3.msra.mxu1 %v3301_v18  ;;  %2885 = vmatpush3.msra.mxu0 %v3307_v21 }
  0xd7   :  { %2913 = vmatprep.subr.mxu1 %v3324_v26  ;;  %2886 = vmatprep.subr.mxu0 %v3310_v22 }
  0xd8   :  { %2914 = vmatpush3.msra.mxu1 %v3324_v26  ;;  %2887 = vmatpush3.msra.mxu0 %v3310_v22 }
  0xd9   :  { %2916 = vmatmul.mubr.f32.vlgmr.msra.gmra.mxu1 %v740_v57  ;;  %2937 = vmatprep.subr.mxu1 %v3285_v5 }
  0xda   :  { %2888 = vmatprep.subr.mxu0 %v3319_v24  ;;  %2938 = vmatpush3.msra.mxu1 %v3285_v5 }
  0xdb   :  { %2953 = vmatprep.mubr.msk.f32.mxu1 %vm50_vm0, %v3523_v42  ;;  %2889 = vmatpush3.msra.mxu0 %v3319_v24 }
  0xdc   :  { %2939 = vmatprep.subr.mxu1 %v3287_v9  ;;  %2890 = vmatprep.subr.mxu0 %v3322_v25 }
  0xdd   :  { %2940 = vmatpush3.msra.mxu1 %v3287_v9  ;;  %2891 = vmatpush3.msra.mxu0 %v3322_v25 }
  0xde   :  { %2941 = vmatprep.subr.mxu1 %v3289_v10  ;;  %2892 = vmatprep.subr.mxu0 %v3343_v32 }
  0xdf   :  { %2942 = vmatpush3.msra.mxu1 %v3289_v10  ;;  %2893 = vmatpush3.msra.mxu0 %v3343_v32 }
  0xe0   :  { %2943 = vmatprep.subr.mxu1 %v3291_v11  ;;  %2894 = vmatprep.subr.mxu0 %v3358_v39 }
  0xe1   :  { %2944 = vmatpush3.msra.mxu1 %v3291_v11  ;;  %2895 = vmatpush3.msra.mxu0 %v3358_v39 }
  0xe2   :  { %2945 = vmatprep.subr.mxu1 %v3296_v16  ;;  %2897 = vmatmul.mubr.f32.vlgmr.msra.gmra.mxu0 %v3559_v55 }
  0xe3   :  { %2918 = vmatprep.subr.mxu0 %v3316_v23  ;;  %2946 = vmatpush3.msra.mxu1 %v3296_v16 }
  0xe4   :  { %2919 = vmatpush3.msra.mxu0 %v3316_v23  ;;  %2934 = vmatprep.mubr.msk.f32.mxu0 %vm50_vm0, %v3523_v42 }
  0xe5   :  { %2947 = vmatprep.subr.mxu1 %v3299_v17  ;;  %2920 = vmatprep.subr.mxu0 %v3327_v27 }
  0xe6   :  { %2948 = vmatpush3.msra.mxu1 %v3299_v17  ;;  %2921 = vmatpush3.msra.mxu0 %v3327_v27 }
  0xe7   :  { %2949 = vmatprep.subr.mxu1 %v3301_v18  ;;  %2922 = vmatprep.subr.mxu0 %v3330_v28 }
  0xe8   :  { %2950 = vmatpush3.msra.mxu1 %v3301_v18  ;;  %2923 = vmatpush3.msra.mxu0 %v3330_v28 }
  0xe9   :  { %2951 = vmatprep.subr.mxu1 %v3324_v26  ;;  %2924 = vmatprep.subr.mxu0 %v3333_v29 }
  0xea   :  { %2952 = vmatpush3.msra.mxu1 %v3324_v26  ;;  %2925 = vmatpush3.msra.mxu0 %v3333_v29 }
  0xeb   :  { %2954 = vmatmul.mubr.msk.f32.vlgmr.msra.gmra.mxu1 %vm50_vm0, %v3544_v50  ;;  %2975 = vmatprep.subr.mxu1 %v3350_v36 }
  0xec   :  { %2926 = vmatprep.subr.mxu0 %v3339_v31  ;;  %2976 = vmatpush3.msra.mxu1 %v3350_v36 }
  0xed   :  { %2927 = vmatpush3.msra.mxu0 %v3339_v31  ;;  %2977 = vmatprep.subr.mxu1 %v3362_v40 }
  0xee   :  { %2928 = vmatprep.subr.mxu0 %v3355_v38  ;;  %2978 = vmatpush3.msra.mxu1 %v3362_v40 }
  0xef   :  { %2929 = vmatpush3.msra.mxu0 %v3355_v38  ;;  %2979 = vmatprep.subr.mxu1 %v3365_v41 }
  0xf0   :  { %2930 = vmatprep.subr.mxu0 %v3370_v43  ;;  %2980 = vmatpush3.msra.mxu1 %v3365_v41 }
  0xf1   :  { %2931 = vmatpush3.msra.mxu0 %v3370_v43  ;;  %2981 = vmatprep.subr.mxu1 %v3376_v44 }
  0xf2   :  { %2932 = vmatprep.subr.mxu0 %v3381_v46  ;;  %2982 = vmatpush3.msra.mxu1 %v3376_v44 }
  0xf3   :  { %2933 = vmatpush3.msra.mxu0 %v3381_v46  ;;  %2983 = vmatprep.subr.mxu1 %v3387_v47 }
  0xf4   :  { %2935 = vmatmul.mubr.msk.f32.vlgmr.msra.gmra.mxu0 %vm50_vm0, %v3544_v50  ;;  %2956 = vmatprep.subr.mxu0 %v3285_v5 }
  0xf5   :  { %2984 = vmatpush3.msra.mxu1 %v3387_v47  ;;  %2957 = vmatpush3.msra.mxu0 %v3285_v5 }
  0xf6   :  { %2985 = vmatprep.subr.mxu1 %v3395_v49  ;;  %2958 = vmatprep.subr.mxu0 %v3287_v9 }
  0xf7   :  { %2986 = vmatpush3.msra.mxu1 %v3395_v49  ;;  %2959 = vmatpush3.msra.mxu0 %v3287_v9 }
  0xf8   :  { %2987 = vmatprep.subr.mxu1 %v3403_v51  ;;  %2960 = vmatprep.subr.mxu0 %v3289_v10 }
  0xf9   :  { %2988 = vmatpush3.msra.mxu1 %v3403_v51  ;;  %2961 = vmatpush3.msra.mxu0 %v3289_v10 }
  0xfa   :  { %2989 = vmatprep.subr.mxu1 %v3409_v52  ;;  %2962 = vmatprep.subr.mxu0 %v3291_v11 }
  0xfb   :  { %2990 = vmatpush3.msra.mxu1 %v3409_v52  ;;  %2991 = vmatprep.mubr.msk.f32.mxu1 %vm50_vm0, %v3449_v13 }
  0xfc   :  { %2963 = vmatpush3.msra.mxu0 %v3291_v11  ;;  %2992 = vmatmul.mubr.msk.f32.vlgmr.msra.gmra.mxu1 %vm50_vm0, %v3454_v19 }
  0xfd   :  { %3013 = vmatprep.subr.mxu1 %v3285_v5  ;;  %2964 = vmatprep.subr.mxu0 %v3296_v16 }
  0xfe   :  { %3014 = vmatpush3.msra.mxu1 %v3285_v5  ;;  %2965 = vmatpush3.msra.mxu0 %v3296_v16 }
  0xff   :  { %3015 = vmatprep.subr.mxu1 %v3287_v9  ;;  %2966 = vmatprep.subr.mxu0 %v3299_v17 }
 0x100   :  { %3016 = vmatpush3.msra.mxu1 %v3287_v9  ;;  %2967 = vmatpush3.msra.mxu0 %v3299_v17 }
 0x101   :  { %3017 = vmatprep.subr.mxu1 %v3289_v10  ;;  %2968 = vmatprep.subr.mxu0 %v3301_v18 }
 0x102   :  { %3018 = vmatpush3.msra.mxu1 %v3289_v10  ;;  %3029 = vmatprep.mubr.f32.mxu1 %v1330_v1 }
 0x103   :  { %2969 = vmatpush3.msra.mxu0 %v3301_v18  ;;  %3019 = vmatprep.subr.mxu1 %v3291_v11 }
 0x104   :  { %2970 = vmatprep.subr.mxu0 %v3324_v26  ;;  %2972 = vmatprep.mubr.f32.mxu0 %v1332_v6 }
 0x105   :  { %3020 = vmatpush3.msra.mxu1 %v3291_v11  ;;  %2971 = vmatpush3.msra.mxu0 %v3324_v26 }
 0x106   :  { %3021 = vmatprep.subr.mxu1 %v3296_v16  ;;  %2973 = vmatmul.mubr.f32.vlgmr.msra.gmra.mxu0 %v1342_v7 }
 0x107   :  { %2994 = vmatprep.subr.mxu0 %v3294_v15  ;;  %3022 = vmatpush3.msra.mxu1 %v3296_v16 }
 0x108   :  { %2995 = vmatpush3.msra.mxu0 %v3294_v15  ;;  %3010 = vmatprep.mubr.f32.mxu0 %v1329_v63 }
 0x109   :  { %3023 = vmatprep.subr.mxu1 %v3299_v17  ;;  %2996 = vmatprep.subr.mxu0 %v3304_v20 }
 0x10a   :  { %3024 = vmatpush3.msra.mxu1 %v3299_v17  ;;  %2997 = vmatpush3.msra.mxu0 %v3304_v20 }
 0x10b   :  { %3025 = vmatprep.subr.mxu1 %v3301_v18  ;;  %2998 = vmatprep.subr.mxu0 %v3307_v21 }
 0x10c   :  { %3026 = vmatpush3.msra.mxu1 %v3301_v18  ;;  %2999 = vmatpush3.msra.mxu0 %v3307_v21 }
 0x10d   :  { %3027 = vmatprep.subr.mxu1 %v3324_v26  ;;  %3000 = vmatprep.subr.mxu0 %v3310_v22 }
 0x10e   :  { %3028 = vmatpush3.msra.mxu1 %v3324_v26  ;;  %3001 = vmatpush3.msra.mxu0 %v3310_v22 }
 0x10f   :  { %3030 = vmatmul.mubr.f32.vlgmr.msra.gmra.mxu1 %v1340_v2  ;;  %3051 = vmatprep.subr.mxu1 %v3285_v5 }
 0x110   :  { %3002 = vmatprep.subr.mxu0 %v3319_v24  ;;  %3052 = vmatpush3.msra.mxu1 %v3285_v5 }
 0x111   :  { %3067 = vmatprep.mubr.msk.f32.mxu1 %vm50_vm0, %v3449_v13  ;;  %3003 = vmatpush3.msra.mxu0 %v3319_v24 }
 0x112   :  { %3053 = vmatprep.subr.mxu1 %v3287_v9  ;;  %3004 = vmatprep.subr.mxu0 %v3322_v25 }
 0x113   :  { %3054 = vmatpush3.msra.mxu1 %v3287_v9  ;;  %3005 = vmatpush3.msra.mxu0 %v3322_v25 }
 0x114   :  { %3055 = vmatprep.subr.mxu1 %v3289_v10  ;;  %3006 = vmatprep.subr.mxu0 %v3343_v32 }
 0x115   :  { %3056 = vmatpush3.msra.mxu1 %v3289_v10  ;;  %3007 = vmatpush3.msra.mxu0 %v3343_v32 }
 0x116   :  { %3057 = vmatprep.subr.mxu1 %v3291_v11  ;;  %3008 = vmatprep.subr.mxu0 %v3358_v39 }
 0x117   :  { %3058 = vmatpush3.msra.mxu1 %v3291_v11  ;;  %3009 = vmatpush3.msra.mxu0 %v3358_v39 }
 0x118   :  { %3059 = vmatprep.subr.mxu1 %v3296_v16  ;;  %3011 = vmatmul.mubr.f32.vlgmr.msra.gmra.mxu0 %v3674_v0 }
 0x119   :  { %3032 = vmatprep.subr.mxu0 %v3316_v23  ;;  %3060 = vmatpush3.msra.mxu1 %v3296_v16 }
 0x11a   :  { %3033 = vmatpush3.msra.mxu0 %v3316_v23  ;;  %3048 = vmatprep.mubr.msk.f32.mxu0 %vm50_vm0, %v3449_v13 }
 0x11b   :  { %3061 = vmatprep.subr.mxu1 %v3299_v17  ;;  %3034 = vmatprep.subr.mxu0 %v3327_v27 }
 0x11c   :  { %3062 = vmatpush3.msra.mxu1 %v3299_v17  ;;  %3035 = vmatpush3.msra.mxu0 %v3327_v27 }
 0x11d   :  { %3063 = vmatprep.subr.mxu1 %v3301_v18  ;;  %3036 = vmatprep.subr.mxu0 %v3330_v28 }
 0x11e   :  { %3064 = vmatpush3.msra.mxu1 %v3301_v18  ;;  %3037 = vmatpush3.msra.mxu0 %v3330_v28 }
 0x11f   :  { %3065 = vmatprep.subr.mxu1 %v3324_v26  ;;  %3038 = vmatprep.subr.mxu0 %v3333_v29 }
 0x120   :  { %3066 = vmatpush3.msra.mxu1 %v3324_v26  ;;  %3039 = vmatpush3.msra.mxu0 %v3333_v29 }
 0x121   :  { %3068 = vmatmul.mubr.msk.f32.vlgmr.msra.gmra.mxu1 %vm50_vm0, %v3454_v19  ;;  %3089 = vmatprep.subr.mxu1 %v3350_v36 }
 0x122   :  { %3040 = vmatprep.subr.mxu0 %v3339_v31  ;;  %3090 = vmatpush3.msra.mxu1 %v3350_v36  ;;  %v1850_v36 = vsel %vm50_vm0, %v3499_v34, 0 }
 0x123   :  { %3041 = vmatpush3.msra.mxu0 %v3339_v31  ;;  %3091 = vmatprep.subr.mxu1 %v3362_v40 }
 0x124   :  { %3042 = vmatprep.subr.mxu0 %v3355_v38  ;;  %3092 = vmatpush3.msra.mxu1 %v3362_v40  ;;  %v1853_v40 = vsel %vm50_vm0, %v3507_v37, 0 }
 0x125   :  { %3043 = vmatpush3.msra.mxu0 %v3355_v38  ;;  %3093 = vmatprep.subr.mxu1 %v3365_v41 }
 0x126   :  { %3044 = vmatprep.subr.mxu0 %v3370_v43  ;;  %3094 = vmatpush3.msra.mxu1 %v3365_v41  ;;  %v1929_v41 = vsub.f32 %v1850_v36, %v1850_v36 }
 0x127   :  { %3045 = vmatpush3.msra.mxu0 %v3370_v43  ;;  %3095 = vmatprep.subr.mxu1 %v3376_v44 }
 0x128   :  { %3046 = vmatprep.subr.mxu0 %v3381_v46  ;;  %3096 = vmatpush3.msra.mxu1 %v3376_v44  ;;  %v3791_v44 = vsub.f32 %v1853_v40, %v1853_v40  ;;  %v1930_v8 = vand.u32 4294901760, %v1929_v41 }
 0x129   :  { %3047 = vmatpush3.msra.mxu0 %v3381_v46  ;;  %3097 = vmatprep.subr.mxu1 %v3387_v47 }
 0x12a   :  { %3049 = vmatmul.mubr.msk.f32.vlgmr.msra.gmra.mxu0 %vm50_vm0, %v3454_v19  ;;  %3070 = vmatprep.subr.mxu0 %v3285_v5 }
 0x12b   :  { %3098 = vmatpush3.msra.mxu1 %v3387_v47  ;;  %3071 = vmatpush3.msra.mxu0 %v3285_v5  ;;  %v1940_v47 = vand.u32 4294901760, %v3791_v44 }
 0x12c   :  { %3099 = vmatprep.subr.mxu1 %v3395_v49  ;;  %3072 = vmatprep.subr.mxu0 %v3287_v9 }
 0x12d   :  { %3100 = vmatpush3.msra.mxu1 %v3395_v49  ;;  %3073 = vmatpush3.msra.mxu0 %v3287_v9  ;;  %v1931_v49 = vsub.f32 %v1929_v41, %v1930_v8 }
 0x12e   :  { %3101 = vmatprep.subr.mxu1 %v3403_v51  ;;  %3074 = vmatprep.subr.mxu0 %v3289_v10 }
 0x12f   :  { %3102 = vmatpush3.msra.mxu1 %v3403_v51  ;;  %3075 = vmatpush3.msra.mxu0 %v3289_v10  ;;  %v1941_v51 = vsub.f32 %v3791_v44, %v1940_v47 }
 0x130   :  { %3103 = vmatprep.subr.mxu1 %v3409_v52  ;;  %3076 = vmatprep.subr.mxu0 %v3291_v11 }
 0x131   :  { %3104 = vmatpush3.msra.mxu1 %v3409_v52  ;;  %3105 = vmatprep.mubr.msk.f32.mxu1 %vm50_vm0, %v3499_v34  ;;  %v1932_v52 = vand.u32 4294901760, %v1931_v49  ;;  %v1942_v12 = vand.u32 4294901760, %v1941_v51 }
 0x132   :  { %3077 = vmatpush3.msra.mxu0 %v3291_v11  ;;  %3106 = vmatmul.mubr.msk.f32.vlgmr.msra.gmra.mxu1 %vm50_vm0, %v3507_v37 }
 0x133   :  { %3127 = vmatprep.subr.mxu1 %v3285_v5  ;;  %3078 = vmatprep.subr.mxu0 %v3296_v16 }
 0x134   :  { %3128 = vmatpush3.msra.mxu1 %v3285_v5  ;;  %3079 = vmatpush3.msra.mxu0 %v3296_v16 }
 0x135   :  { %3129 = vmatprep.subr.mxu1 %v3287_v9  ;;  %3080 = vmatprep.subr.mxu0 %v3299_v17 }
 0x136   :  { %3130 = vmatpush3.msra.mxu1 %v3287_v9  ;;  %3081 = vmatpush3.msra.mxu0 %v3299_v17 }
 0x137   :  { %3131 = vmatprep.subr.mxu1 %v3289_v10  ;;  %3082 = vmatprep.subr.mxu0 %v3301_v18 }
 0x138   :  { %3132 = vmatpush3.msra.mxu1 %v3289_v10  ;;  %3143 = vmatprep.mubr.f32.mxu1 %v1930_v8 }
 0x139   :  { %3083 = vmatpush3.msra.mxu0 %v3301_v18  ;;  %3133 = vmatprep.subr.mxu1 %v3291_v11 }
 0x13a   :  { %3084 = vmatprep.subr.mxu0 %v3324_v26  ;;  %3086 = vmatprep.mubr.f32.mxu0 %v1932_v52 }
 0x13b   :  { %3134 = vmatpush3.msra.mxu1 %v3291_v11  ;;  %3085 = vmatpush3.msra.mxu0 %v3324_v26 }
 0x13c   :  { %3135 = vmatprep.subr.mxu1 %v3296_v16  ;;  %3087 = vmatmul.mubr.f32.vlgmr.msra.gmra.mxu0 %v1942_v12 }
 0x13d   :  { %3108 = vmatprep.subr.mxu0 %v3294_v15  ;;  %3136 = vmatpush3.msra.mxu1 %v3296_v16 }
 0x13e   :  { %3109 = vmatpush3.msra.mxu0 %v3294_v15  ;;  %3124 = vmatprep.mubr.f32.mxu0 %v1929_v41 }
 0x13f   :  { %3137 = vmatprep.subr.mxu1 %v3299_v17  ;;  %3110 = vmatprep.subr.mxu0 %v3304_v20 }
 0x140   :  { %3138 = vmatpush3.msra.mxu1 %v3299_v17  ;;  %3111 = vmatpush3.msra.mxu0 %v3304_v20 }
 0x141   :  { %3139 = vmatprep.subr.mxu1 %v3301_v18  ;;  %3112 = vmatprep.subr.mxu0 %v3307_v21 }
 0x142   :  { %3140 = vmatpush3.msra.mxu1 %v3301_v18  ;;  %3113 = vmatpush3.msra.mxu0 %v3307_v21 }
 0x143   :  { %3141 = vmatprep.subr.mxu1 %v3324_v26  ;;  %3114 = vmatprep.subr.mxu0 %v3310_v22 }
 0x144   :  { %3142 = vmatpush3.msra.mxu1 %v3324_v26  ;;  %3115 = vmatpush3.msra.mxu0 %v3310_v22 }
 0x145   :  { %3144 = vmatmul.mubr.f32.vlgmr.msra.gmra.mxu1 %v1940_v47  ;;  %3165 = vmatprep.subr.mxu1 %v3285_v5 }
 0x146   :  { %3116 = vmatprep.subr.mxu0 %v3319_v24  ;;  %3166 = vmatpush3.msra.mxu1 %v3285_v5 }
 0x147   :  { %3181 = vmatprep.mubr.msk.f32.mxu1 %vm50_vm0, %v3499_v34  ;;  %3117 = vmatpush3.msra.mxu0 %v3319_v24 }
 0x148   :  { %3167 = vmatprep.subr.mxu1 %v3287_v9  ;;  %3118 = vmatprep.subr.mxu0 %v3322_v25 }
 0x149   :  { %3168 = vmatpush3.msra.mxu1 %v3287_v9  ;;  %3119 = vmatpush3.msra.mxu0 %v3322_v25 }
 0x14a   :  { %3169 = vmatprep.subr.mxu1 %v3289_v10  ;;  %3120 = vmatprep.subr.mxu0 %v3343_v32 }
 0x14b   :  { %3170 = vmatpush3.msra.mxu1 %v3289_v10  ;;  %3121 = vmatpush3.msra.mxu0 %v3343_v32 }
 0x14c   :  { %3171 = vmatprep.subr.mxu1 %v3291_v11  ;;  %3122 = vmatprep.subr.mxu0 %v3358_v39 }
 0x14d   :  { %3172 = vmatpush3.msra.mxu1 %v3291_v11  ;;  %3123 = vmatpush3.msra.mxu0 %v3358_v39 }
 0x14e   :  { %3173 = vmatprep.subr.mxu1 %v3296_v16  ;;  %3125 = vmatmul.mubr.f32.vlgmr.msra.gmra.mxu0 %v3791_v44 }
 0x14f   :  { %3146 = vmatprep.subr.mxu0 %v3316_v23  ;;  %3174 = vmatpush3.msra.mxu1 %v3296_v16 }
 0x150   :  { %3147 = vmatpush3.msra.mxu0 %v3316_v23  ;;  %3162 = vmatprep.mubr.msk.f32.mxu0 %vm50_vm0, %v3499_v34 }
 0x151   :  { %3175 = vmatprep.subr.mxu1 %v3299_v17  ;;  %3148 = vmatprep.subr.mxu0 %v3327_v27 }
 0x152   :  { %3176 = vmatpush3.msra.mxu1 %v3299_v17  ;;  %3149 = vmatpush3.msra.mxu0 %v3327_v27  ;;  %v2765_v9 = vpop.f32.mrf.mxu1 }
 0x153   :  { %3177 = vmatprep.subr.mxu1 %v3301_v18  ;;  %3150 = vmatprep.subr.mxu0 %v3330_v28 }
 0x154   :  { %3178 = vmatpush3.msra.mxu1 %v3301_v18  ;;  %3151 = vmatpush3.msra.mxu0 %v3330_v28  ;;  %v257_v15 = vpop.f32.mrf.mxu1 }
 0x155   :  { %3179 = vmatprep.subr.mxu1 %v3324_v26  ;;  %3152 = vmatprep.subr.mxu0 %v3333_v29 }
 0x156   :  { %3180 = vmatpush3.msra.mxu1 %v3324_v26  ;;  %3153 = vmatpush3.msra.mxu0 %v3333_v29 }
 0x157   :  { %3182 = vmatmul.mubr.msk.f32.vlgmr.msra.gmra.mxu1 %vm50_vm0, %v3507_v37  ;;  %3154 = vmatprep.subr.mxu0 %v3339_v31 }
 0x158   :  { %3155 = vmatpush3.msra.mxu0 %v3339_v31 }
 0x159   :  { %3156 = vmatprep.subr.mxu0 %v3355_v38 }
 0x15a   :  { %3157 = vmatpush3.msra.mxu0 %v3355_v38 }
 0x15b   :  { %3158 = vmatprep.subr.mxu0 %v3370_v43  ;;  %v2746_v5 = vpop.f32.mrf.mxu0 }
 0x15c   :  { %3159 = vmatpush3.msra.mxu0 %v3370_v43  ;;  %v264_v54 = vadd.f32 %v2765_v9, %v2746_v5 }
 0x15d   :  { %3160 = vmatprep.subr.mxu0 %v3381_v46  ;;  %v136_v10 = vpop.f32.mrf.mxu0 }
 0x15e   :  { %3161 = vmatpush3.msra.mxu0 %v3381_v46  ;;  %v258_v59 = vadd.f32 %v257_v15, %v136_v10 }
 0x15f   :  { %3163 = vmatmul.mubr.msk.f32.vlgmr.msra.gmra.mxu0 %vm50_vm0, %v3507_v37 }
 0x163   :  { %v2803_v16 = vpop.f32.mrf.mxu1 }
 0x165   :  { %v439_v20 = vpop.f32.mrf.mxu1 }
 0x16c   :  { %v2784_v11 = vpop.f32.mrf.mxu0 }
 0x16d   :  { %v359_v60 = vadd.f32 %v2784_v11, %v264_v54 }
 0x16e   :  { %v351_v17 = vpop.f32.mrf.mxu0 }
 0x16f   :  { %v352_v2 = vadd.f32 %v351_v17, %v258_v59  ;;  %v448_v7 = vadd.f32 %v2803_v16, %v359_v60 }
 0x171   :  { %v440_v49 = vadd.f32 %v439_v20, %v352_v2 }
 0x175   :  { %v3890_v21 = vpop.f32.mrf.mxu1 }
 0x177   :  { %v3892_v24 = vpop.f32.mrf.mxu1 }
 0x17e   :  { %v2822_v18 = vpop.f32.mrf.mxu0 }
 0x17f   :  { %v549_v47 = vadd.f32 %v2822_v18, %v448_v7 }
 0x180   :  { %v542_v22 = vpop.f32.mrf.mxu0 }
 0x181   :  { %v543_v15 = vadd.f32 %v542_v22, %v440_v49  ;;  %v634_v16 = vadd.f32 %v3890_v21, %v549_v47 }
 0x183   :  { %v628_v18 = vadd.f32 %v3892_v24, %v543_v15 }
 0x186   :  { %v2879_v25 = vpop.f32.mrf.mxu1 }
 0x188   :  { %v855_v28 = vpop.f32.mrf.mxu1 }
 0x190   :  { %v2860_v23 = vpop.f32.mrf.mxu0 }
 0x191   :  { %v862_v53 = vadd.f32 %v2879_v25, %v2860_v23 }
 0x192   :  { %v734_v26 = vpop.f32.mrf.mxu0 }
 0x193   :  { %v856_v55 = vadd.f32 %v855_v28, %v734_v26 }
 0x199   :  { %v2917_v29 = vpop.f32.mrf.mxu1 }
 0x19b   :  { %v1037_v38 = vpop.f32.mrf.mxu1 }
 0x1a2   :  { %v2898_v27 = vpop.f32.mrf.mxu0 }
 0x1a3   :  { %v957_v57 = vadd.f32 %v2898_v27, %v862_v53 }
 0x1a4   :  { %v949_v31 = vpop.f32.mrf.mxu0 }
 0x1a5   :  { %v950_v61 = vadd.f32 %v949_v31, %v856_v55  ;;  %v1046_v4 = vadd.f32 %v2917_v29, %v957_v57 }
 0x1a7   :  { %v1038_v36 = vadd.f32 %v1037_v38, %v950_v61 }
 0x1ab   :  { %v2955_v39 = vpop.f32.mrf.mxu1 }
 0x1ad   :  { %v1225_v13 = vpop.f32.mrf.mxu1 }
 0x1b4   :  { %v2936_v32 = vpop.f32.mrf.mxu0 }
 0x1b5   :  { %v1147_v41 = vadd.f32 %v2936_v32, %v1046_v4 }
 0x1b6   :  { %v1140_v43 = vpop.f32.mrf.mxu0 }
 0x1b7   :  { %v1141_v51 = vadd.f32 %v1140_v43, %v1038_v36  ;;  %v1232_v17 = vadd.f32 %v2955_v39, %v1147_v41 }
 0x1b9   :  { %v1226_v27 = vadd.f32 %v1225_v13, %v1141_v51  ;;  %v1236_v32 = vmax.f32 %v634_v16, %v1232_v17 }
 0x1bc   :  { %v2993_v14 = vpop.f32.mrf.mxu1 }
 0x1be   :  { %v1455_v33 = vpop.f32.mrf.mxu1 }
 0x1c6   :  { %v2974_v46 = vpop.f32.mrf.mxu0 }
 0x1c7   :  { %v1462_v58 = vadd.f32 %v2993_v14, %v2974_v46 }
 0x1c8   :  { %v1334_v19 = vpop.f32.mrf.mxu0 }
 0x1c9   :  { %v1456_v0 = vadd.f32 %v1455_v33, %v1334_v19  ;;  %v1235_v19 = vmax.f32 %v628_v18, %v1226_v27 }
 0x1cf   :  { %v3031_v34 = vpop.f32.mrf.mxu1 }
 0x1d1   :  { %v1637_v42 = vpop.f32.mrf.mxu1 }
 0x1d8   :  { %v3012_v30 = vpop.f32.mrf.mxu0 }
 0x1d9   :  { %v1557_v1 = vadd.f32 %v3012_v30, %v1462_v58 }
 0x1da   :  { %v1549_v35 = vpop.f32.mrf.mxu0 }
 0x1db   :  { %v1550_v6 = vadd.f32 %v1549_v35, %v1456_v0  ;;  %v1646_v44 = vadd.f32 %v3031_v34, %v1557_v1 }
 0x1dd   :  { %v1638_v9 = vadd.f32 %v1637_v42, %v1550_v6 }
 0x1e1   :  { %v3069_v45 = vpop.f32.mrf.mxu1 }
 0x1e3   :  { %v1825_v56 = vpop.f32.mrf.mxu1 }
 0x1ea   :  { %v3050_v37 = vpop.f32.mrf.mxu0 }
 0x1eb   :  { %v1747_v5 = vadd.f32 %v3050_v37, %v1646_v44 }
 0x1ec   :  { %v1740_v48 = vpop.f32.mrf.mxu0 }
 0x1ed   :  { %v1741_v23 = vadd.f32 %v1740_v48, %v1638_v9  ;;  %v1832_v28 = vadd.f32 %v3069_v45, %v1747_v5 }
 0x1ef   :  { %v1826_v38 = vadd.f32 %v1825_v56, %v1741_v23  ;;  %v1836_v22 = vmax.f32 %v1236_v32, %v1832_v28 }
 0x1f1   :  { %v1835_v21 = vmax.f32 %v1235_v19, %v1826_v38 }
 0x1f2   :  { %v3107_v62 = vpop.f32.mrf.mxu1 }
 0x1f4   :  { %v2055_v40 = vpop.f32.mrf.mxu1 }
 0x1fc   :  { %v3088_v50 = vpop.f32.mrf.mxu0 }
 0x1fd   :  { %v2062_v8 = vadd.f32 %v3107_v62, %v3088_v50 }
 0x1fe   :  { %v1934_v63 = vpop.f32.mrf.mxu0 }
 0x1ff   :  { %v2056_v10 = vadd.f32 %v2055_v40, %v1934_v63 }
 0x205   :  { %v3145_v52 = vpop.f32.mrf.mxu1 }
 0x207   :  { %v2237_v26 = vpop.f32.mrf.mxu1 }
 0x20e   :  { %v3126_v3 = vpop.f32.mrf.mxu0 }
 0x20f   :  { %v2157_v11 = vadd.f32 %v3126_v3, %v2062_v8 }
 0x210   :  { %v2149_v12 = vpop.f32.mrf.mxu0 }
 0x211   :  { %v2150_v25 = vadd.f32 %v2149_v12, %v2056_v10  ;;  %v2246_v29 = vadd.f32 %v3145_v52, %v2157_v11 }
 0x213   :  { %v2238_v46 = vadd.f32 %v2237_v26, %v2150_v25 }
 0x217   :  { %v3183_v20 = vpop.f32.mrf.mxu1 }
 0x219   :  { %v2425_v33 = vpop.f32.mrf.mxu1 }
 0x21f   :  { %v3164_v31 = vpop.f32.mrf.mxu0 }
 0x220   :  { %v2347_v43 = vadd.f32 %v3164_v31, %v2246_v29 }
 0x221   :  { %v2340_v14 = vpop.f32.mrf.mxu0 }
 0x222   :  { %v2432_v39 = vadd.f32 %v3183_v20, %v2347_v43  ;;  %v2341_v30 = vadd.f32 %v2340_v14, %v2238_v46 }
 0x224   :  { %v2436_v13 = vmax.f32 %v1836_v22, %v2432_v39  ;;  %v2426_v34 = vadd.f32 %v2425_v33, %v2341_v30 }
 0x226   :  { %2438 = vst [vmem:[#allocation5 + $0x8] sm:$0xff] %v2436_v13  ;;  %v2435_v35 = vmax.f32 %v1835_v21, %v2426_v34 }
 0x228   :  { %2437 = vst [vmem:[#allocation5] sm:$0xff] %v2435_v35 }
 0x229   :  { %3230 = shalt.err (!%p3227_p9)
}
 0x22a   :  { %2450 = dma.vmem_to_hbm [thread:$0]  %s2445_s1, 256, %s3904_s2, [#allocation4], %s3244_s12, %s3244_s12, %s3245_s13  }
 0x22b   :  { %3241 = dma.done.wait [#allocation4], 256  }
 0x22c   :  { %3242 = vsyncadd [#allocation4], 4294967040 }
 0x22d   :  { %2454 = vsyncpa [#allocation3], 1 }
 0x22e   :  { %2455 = vsyncpa [#allocation4], 1 }

</bundles_post_ra>
